<compile_context>
chip_gen: v7x
topology: tpu7x:2x2x1
jax: 0.10.0
libtpu: 0.0.40
codegen_flags: <defaults>
</compile_context>

<pallas_src>
import functools

import jax
import jax.numpy as jnp
from jax.experimental import pallas as pl
from jax.experimental.pallas import tpu as pltpu


# ---------------------------------------------------------------------------
# Fused Pallas kernel: both GATConv layers, all heads, in one grid step.
# ---------------------------------------------------------------------------
def _gat_fused_kernel(h_ref, adj_ref, w0_ref, al0_ref, ar0_ref,
                      w1_ref, al1_ref, ar1_ref, out_ref,
                      *, num_heads, hid, n_classes, num_out_heads, negative_slope):
    neg = jnp.float32(negative_slope)
    big_neg = jnp.float32(-1e30)

    # Dense adjacency mask adj[dst, src]; int8 in HBM/VMEM, bool/f32 in registers.
    mask = adj_ref[...].astype(jnp.float32) > 0.0          # (N, N) bool
    mask_f = mask.astype(jnp.float32)

    def edge_softmax(e):
        # leaky_relu + masked softmax over src axis (-1).
        # NOTE: the mask_f multiply after exp keeps zero in-degree rows at alpha == 0.
        e = jnp.where(e >= 0, e, neg * e)
        e = jnp.where(mask, e, big_neg)
        m = jnp.max(e, axis=-1, keepdims=True)
        p = jnp.exp(e - m) * mask_f
        denom = jnp.maximum(jnp.sum(p, axis=-1, keepdims=True), jnp.float32(1e-30))
        return p / denom

    def elu(x):
        return jnp.where(x > 0, x, jnp.exp(jnp.minimum(x, 0.0)) - 1.0)

    # ------------------------- Layer 0: all heads fused -------------------------
    h0 = h_ref[...].astype(jnp.float32)                     # (N, Fin)
    w0 = w0_ref[...]                                        # (Fin, H*hid)
    if h_ref.shape[1] == 1:
        # K=1 projection: pure VPU broadcast multiply (outer product), no MXU
        # push/drain latency for a degenerate matmul.
        feat0 = h0 * w0                                     # (N, H*hid)
    else:
        feat0 = jnp.dot(h0, w0, preferred_element_type=jnp.float32)

    # Attention logits contributions for every head at once (VPU, exact f32).
    el_prod = feat0 * al0_ref[...]                          # (N, H*hid)
    er_prod = feat0 * ar0_ref[...]                          # (N, H*hid)

    el_cols, er_cols = [], []
    for hd in range(num_heads):
        sl = slice(hd * hid, (hd + 1) * hid)
        el_cols.append(jnp.sum(el_prod[:, sl], axis=-1, keepdims=True))   # (N, 1)
        er_cols.append(jnp.sum(er_prod[:, sl], axis=-1, keepdims=True))   # (N, 1)
    # Single (N, H) -> (H, N) XLU transpose gives every head's el row.
    el_rows = jnp.concatenate(el_cols, axis=-1).T           # (H, N)

    h1_chunks = []
    for hd in range(num_heads):
        e = er_cols[hd] + el_rows[hd:hd + 1, :]             # (N_dst, N_src)
        alpha = edge_softmax(e)
        f_h = feat0[:, hd * hid:(hd + 1) * hid]             # (N, hid)
        r = jnp.dot(alpha, f_h, preferred_element_type=jnp.float32)
        h1_chunks.append(elu(r))
    # flatten(1): lane-dense (N, H*hid) slab, stays resident in VMEM/registers.
    h1 = jnp.concatenate(h1_chunks, axis=-1)                # (N, H*hid)

    # --------------------- Layer 1 (output heads) + mean -----------------------
    feat1 = jnp.dot(h1, w1_ref[...], preferred_element_type=jnp.float32)   # (N, OH*C)
    el1_prod = feat1 * al1_ref[...]
    er1_prod = feat1 * ar1_ref[...]

    acc = jnp.zeros((h_ref.shape[0], n_classes), jnp.float32)
    for hd in range(num_out_heads):
        sl = slice(hd * n_classes, (hd + 1) * n_classes)
        el = jnp.sum(el1_prod[:, sl], axis=-1, keepdims=True)   # (N, 1)
        er = jnp.sum(er1_prod[:, sl], axis=-1, keepdims=True)   # (N, 1)
        e = er + el.T                                           # (N, N)
        alpha = edge_softmax(e)
        acc = acc + jnp.dot(alpha, feat1[:, sl], preferred_element_type=jnp.float32)

    # mean over output heads (no activation on the last layer).
    out_ref[...] = (acc * jnp.float32(1.0 / num_out_heads)).astype(out_ref.dtype)


# ---------------------------------------------------------------------------
# Wrapper: one pallas_call, whole problem in VMEM (tiny graph).
# ---------------------------------------------------------------------------
def gat_forward(prepped, adj_i8, h, *, num_heads=8, hidden_features=8,
                n_classes=2, num_out_heads=1, negative_slope=0.2):
    N, _ = h.shape
    kernel = functools.partial(
        _gat_fused_kernel,
        num_heads=num_heads, hid=hidden_features, n_classes=n_classes,
        num_out_heads=num_out_heads, negative_slope=negative_slope)

    vmem = lambda: pl.BlockSpec(memory_space=pltpu.MemorySpace.VMEM)
    return pl.pallas_call(
        kernel,
        out_shape=jax.ShapeDtypeStruct((N, n_classes), jnp.float32),
        in_specs=[vmem() for _ in range(8)],
        out_specs=vmem(),
    )(h, adj_i8,
      prepped["w0"], prepped["al0"], prepped["ar0"],
      prepped["w1"], prepped["al1"], prepped["ar1"])


def prepare_gat_params(params, num_heads=8, hidden_features=8,
                       n_classes=2, num_out_heads=1):
    """Hoisted, one-time parameter re-layout (kernel-friendly, head-major lanes)."""
    return {
        "w0": params["w0"].T,                                           # (Fin, H*hid)
        "al0": params["al0"].reshape(1, num_heads * hidden_features),   # (1, H*hid)
        "ar0": params["ar0"].reshape(1, num_heads * hidden_features),
        "w1": params["w1"].T,                                           # (H*hid, OH*C)
        "al1": params["al1"].reshape(1, num_out_heads * n_classes),     # (1, OH*C)
        "ar1": params["ar1"].reshape(1, num_out_heads * n_classes),
    }


# ---------------------------------------------------------------------------
# Parameter construction (GAT defaults: 2 layers, in=1, hidden=8, classes=2,
# heads=8, out_heads=1, elu). DGL GATConv bias is zero-init -> omitted.
# ---------------------------------------------------------------------------
def make_gat_params(key, in_features=1, hidden_features=8, n_classes=2,
                    num_heads=8, num_out_heads=1):
    ks = jax.random.split(key, 6)
    gain = 1.414  # xavier gain used by DGL GATConv (relu gain)

    def xavier(k, shape):
        fan_in, fan_out = shape[1], shape[0]
        std = gain * (2.0 / (fan_in + fan_out)) ** 0.5
        return std * jax.random.normal(k, shape, dtype=jnp.float32)

    return {
        # layer 0: GATConv(in_features, hidden, num_heads); PyTorch layout (H*Fout, Fin)
        "w0": xavier(ks[0], (num_heads * hidden_features, in_features)),
        "al0": 0.1 * jax.random.normal(ks[1], (num_heads, hidden_features), jnp.float32),
        "ar0": 0.1 * jax.random.normal(ks[2], (num_heads, hidden_features), jnp.float32),
        # layer 1: GATConv(hidden*num_heads, n_classes, num_out_heads)
        "w1": xavier(ks[3], (num_out_heads * n_classes, hidden_features * num_heads)),
        "al1": 0.1 * jax.random.normal(ks[4], (num_out_heads, n_classes), jnp.float32),
        "ar1": 0.1 * jax.random.normal(ks[5], (num_out_heads, n_classes), jnp.float32),
    }


# ---------------------------------------------------------------------------
# Pure-JAX reference (same math, no Pallas) for a sanity check.
# ---------------------------------------------------------------------------
def _ref_conv(h, fc_weight, attn_l, attn_r, adj, num_heads, out_feats, apply_elu):
    N = h.shape[0]
    feat = (h @ fc_weight.T).reshape(N, num_heads, out_feats)
    el = jnp.sum(feat * attn_l[None], axis=-1)      # (N, H)
    er = jnp.sum(feat * attn_r[None], axis=-1)      # (N, H)
    e = er[:, None, :] + el[None, :, :]             # (dst, src, H)
    e = jnp.where(e >= 0, e, 0.2 * e)
    mask = (adj > 0)[:, :, None]
    e = jnp.where(mask, e, -1e30)
    m = jnp.max(e, axis=1, keepdims=True)
    p = jnp.exp(e - m) * mask
    alpha = p / jnp.maximum(jnp.sum(p, axis=1, keepdims=True), 1e-30)
    rst = jnp.einsum("dsh,shf->dhf", alpha, feat)
    if apply_elu:
        rst = jnp.where(rst > 0, rst, jnp.exp(jnp.minimum(rst, 0.0)) - 1.0)
    return rst


def gat_forward_ref(params, adj, h):
    h1 = _ref_conv(h, params["w0"], params["al0"], params["ar0"], adj, 8, 8, True)
    h1 = h1.reshape(h1.shape[0], -1)
    h2 = _ref_conv(h1, params["w1"], params["al1"], params["ar1"], adj, 1, 2, False)
    return jnp.mean(h2, axis=1)


if __name__ == "__main__":
    key = jax.random.PRNGKey(0)
    k_feat, k_adj, k_par = jax.random.split(key, 3)

    N = 16            # number of graph nodes
    IN_FEATS = 1      # GAT default in_features

    # Node features (N, in_features)
    h = jax.random.normal(k_feat, (N, IN_FEATS), dtype=jnp.float32)

    # Deterministic random adjacency adj[dst, src] with self-loops
    adj = (jax.random.uniform(k_adj, (N, N)) < 0.3).astype(jnp.float32)
    adj = jnp.maximum(adj, jnp.eye(N, dtype=jnp.float32))
    adj_i8 = (adj > 0).astype(jnp.int8)   # compact mask for the kernel

    params = make_gat_params(k_par)
    prepped = prepare_gat_params(params)  # one-time re-layout, off the forward path

    out = gat_forward(prepped, adj_i8, h)
    out = jax.block_until_ready(out)

    ref = gat_forward_ref(params, adj, h)
    assert out.shape == (N, 2), out.shape
    assert jnp.allclose(out, ref, atol=1e-4, rtol=1e-4), (out, ref)

    print("KERNEL_OK")
</pallas_src>

<mosaic_0001>
module attributes {stable_mosaic.version = 11 : i64} {
  func.func @_gat_fused_kernel(%arg0: memref<16x1xf32, #tpu.memory_space<vmem>>, %arg1: memref<16x16xi8, #tpu.memory_space<vmem>>, %arg2: memref<1x64xf32, #tpu.memory_space<vmem>>, %arg3: memref<1x64xf32, #tpu.memory_space<vmem>>, %arg4: memref<1x64xf32, #tpu.memory_space<vmem>>, %arg5: memref<64x2xf32, #tpu.memory_space<vmem>>, %arg6: memref<1x2xf32, #tpu.memory_space<vmem>>, %arg7: memref<1x2xf32, #tpu.memory_space<vmem>>, %arg8: memref<16x2xf32, #tpu.memory_space<vmem>>) attributes {dimension_semantics = [], scalar_prefetch = 0 : i64, scratch_operands = 0 : i64, tpu.core_type = #tpu.core_type<tc>} {
    %c0 = arith.constant 0 : index
    %c0_0 = arith.constant 0 : index
    %0 = vector.load %arg1[%c0, %c0_0] : memref<16x16xi8, #tpu.memory_space<vmem>>, vector<16x16xi8>
    %1 = arith.sitofp %0 : vector<16x16xi8> to vector<16x16xf32>
    %cst = arith.constant 0.000000e+00 : f32
    %2 = vector.broadcast %cst : f32 to vector<16x16xf32>
    %3 = arith.cmpf ogt, %1, %2 : vector<16x16xf32>
    %4 = arith.extui %3 : vector<16x16xi1> to vector<16x16xi32>
    %5 = arith.sitofp %4 : vector<16x16xi32> to vector<16x16xf32>
    %c0_1 = arith.constant 0 : index
    %c0_2 = arith.constant 0 : index
    %6 = vector.load %arg0[%c0_1, %c0_2] : memref<16x1xf32, #tpu.memory_space<vmem>>, vector<16x1xf32>
    %c0_3 = arith.constant 0 : index
    %c0_4 = arith.constant 0 : index
    %7 = vector.load %arg2[%c0_3, %c0_4] : memref<1x64xf32, #tpu.memory_space<vmem>>, vector<1x64xf32>
    %8 = vector.broadcast %6 : vector<16x1xf32> to vector<16x64xf32>
    %9 = vector.broadcast %7 : vector<1x64xf32> to vector<16x64xf32>
    %10 = arith.mulf %8, %9 : vector<16x64xf32>
    %c0_5 = arith.constant 0 : index
    %c0_6 = arith.constant 0 : index
    %11 = vector.load %arg3[%c0_5, %c0_6] : memref<1x64xf32, #tpu.memory_space<vmem>>, vector<1x64xf32>
    %12 = vector.broadcast %11 : vector<1x64xf32> to vector<16x64xf32>
    %13 = arith.mulf %10, %12 : vector<16x64xf32>
    %c0_7 = arith.constant 0 : index
    %c0_8 = arith.constant 0 : index
    %14 = vector.load %arg4[%c0_7, %c0_8] : memref<1x64xf32, #tpu.memory_space<vmem>>, vector<1x64xf32>
    %15 = vector.broadcast %14 : vector<1x64xf32> to vector<16x64xf32>
    %16 = arith.mulf %10, %15 : vector<16x64xf32>
    %17 = vector.extract_strided_slice %13 {offsets = [0, 0], sizes = [16, 8], strides = [1, 1]} : vector<16x64xf32> to vector<16x8xf32>
    %cst_9 = arith.constant dense<0.000000e+00> : vector<16xf32>
    %18 = vector.multi_reduction <add>, %17, %cst_9 [1] : vector<16x8xf32> to vector<16xf32>
    %19 = vector.shape_cast %18 : vector<16xf32> to vector<16x1xf32>
    %20 = vector.extract_strided_slice %16 {offsets = [0, 0], sizes = [16, 8], strides = [1, 1]} : vector<16x64xf32> to vector<16x8xf32>
    %cst_10 = arith.constant dense<0.000000e+00> : vector<16xf32>
    %21 = vector.multi_reduction <add>, %20, %cst_10 [1] : vector<16x8xf32> to vector<16xf32>
    %22 = vector.shape_cast %21 : vector<16xf32> to vector<16x1xf32>
    %23 = vector.extract_strided_slice %13 {offsets = [0, 8], sizes = [16, 8], strides = [1, 1]} : vector<16x64xf32> to vector<16x8xf32>
    %cst_11 = arith.constant dense<0.000000e+00> : vector<16xf32>
    %24 = vector.multi_reduction <add>, %23, %cst_11 [1] : vector<16x8xf32> to vector<16xf32>
    %25 = vector.shape_cast %24 : vector<16xf32> to vector<16x1xf32>
    %26 = vector.extract_strided_slice %16 {offsets = [0, 8], sizes = [16, 8], strides = [1, 1]} : vector<16x64xf32> to vector<16x8xf32>
    %cst_12 = arith.constant dense<0.000000e+00> : vector<16xf32>
    %27 = vector.multi_reduction <add>, %26, %cst_12 [1] : vector<16x8xf32> to vector<16xf32>
    %28 = vector.shape_cast %27 : vector<16xf32> to vector<16x1xf32>
    %29 = vector.extract_strided_slice %13 {offsets = [0, 16], sizes = [16, 8], strides = [1, 1]} : vector<16x64xf32> to vector<16x8xf32>
    %cst_13 = arith.constant dense<0.000000e+00> : vector<16xf32>
    %30 = vector.multi_reduction <add>, %29, %cst_13 [1] : vector<16x8xf32> to vector<16xf32>
    %31 = vector.shape_cast %30 : vector<16xf32> to vector<16x1xf32>
    %32 = vector.extract_strided_slice %16 {offsets = [0, 16], sizes = [16, 8], strides = [1, 1]} : vector<16x64xf32> to vector<16x8xf32>
    %cst_14 = arith.constant dense<0.000000e+00> : vector<16xf32>
    %33 = vector.multi_reduction <add>, %32, %cst_14 [1] : vector<16x8xf32> to vector<16xf32>
    %34 = vector.shape_cast %33 : vector<16xf32> to vector<16x1xf32>
    %35 = vector.extract_strided_slice %13 {offsets = [0, 24], sizes = [16, 8], strides = [1, 1]} : vector<16x64xf32> to vector<16x8xf32>
    %cst_15 = arith.constant dense<0.000000e+00> : vector<16xf32>
    %36 = vector.multi_reduction <add>, %35, %cst_15 [1] : vector<16x8xf32> to vector<16xf32>
    %37 = vector.shape_cast %36 : vector<16xf32> to vector<16x1xf32>
    %38 = vector.extract_strided_slice %16 {offsets = [0, 24], sizes = [16, 8], strides = [1, 1]} : vector<16x64xf32> to vector<16x8xf32>
    %cst_16 = arith.constant dense<0.000000e+00> : vector<16xf32>
    %39 = vector.multi_reduction <add>, %38, %cst_16 [1] : vector<16x8xf32> to vector<16xf32>
    %40 = vector.shape_cast %39 : vector<16xf32> to vector<16x1xf32>
    %41 = vector.extract_strided_slice %13 {offsets = [0, 32], sizes = [16, 8], strides = [1, 1]} : vector<16x64xf32> to vector<16x8xf32>
    %cst_17 = arith.constant dense<0.000000e+00> : vector<16xf32>
    %42 = vector.multi_reduction <add>, %41, %cst_17 [1] : vector<16x8xf32> to vector<16xf32>
    %43 = vector.shape_cast %42 : vector<16xf32> to vector<16x1xf32>
    %44 = vector.extract_strided_slice %16 {offsets = [0, 32], sizes = [16, 8], strides = [1, 1]} : vector<16x64xf32> to vector<16x8xf32>
    %cst_18 = arith.constant dense<0.000000e+00> : vector<16xf32>
    %45 = vector.multi_reduction <add>, %44, %cst_18 [1] : vector<16x8xf32> to vector<16xf32>
    %46 = vector.shape_cast %45 : vector<16xf32> to vector<16x1xf32>
    %47 = vector.extract_strided_slice %13 {offsets = [0, 40], sizes = [16, 8], strides = [1, 1]} : vector<16x64xf32> to vector<16x8xf32>
    %cst_19 = arith.constant dense<0.000000e+00> : vector<16xf32>
    %48 = vector.multi_reduction <add>, %47, %cst_19 [1] : vector<16x8xf32> to vector<16xf32>
    %49 = vector.shape_cast %48 : vector<16xf32> to vector<16x1xf32>
    %50 = vector.extract_strided_slice %16 {offsets = [0, 40], sizes = [16, 8], strides = [1, 1]} : vector<16x64xf32> to vector<16x8xf32>
    %cst_20 = arith.constant dense<0.000000e+00> : vector<16xf32>
    %51 = vector.multi_reduction <add>, %50, %cst_20 [1] : vector<16x8xf32> to vector<16xf32>
    %52 = vector.shape_cast %51 : vector<16xf32> to vector<16x1xf32>
    %53 = vector.extract_strided_slice %13 {offsets = [0, 48], sizes = [16, 8], strides = [1, 1]} : vector<16x64xf32> to vector<16x8xf32>
    %cst_21 = arith.constant dense<0.000000e+00> : vector<16xf32>
    %54 = vector.multi_reduction <add>, %53, %cst_21 [1] : vector<16x8xf32> to vector<16xf32>
    %55 = vector.shape_cast %54 : vector<16xf32> to vector<16x1xf32>
    %56 = vector.extract_strided_slice %16 {offsets = [0, 48], sizes = [16, 8], strides = [1, 1]} : vector<16x64xf32> to vector<16x8xf32>
    %cst_22 = arith.constant dense<0.000000e+00> : vector<16xf32>
    %57 = vector.multi_reduction <add>, %56, %cst_22 [1] : vector<16x8xf32> to vector<16xf32>
    %58 = vector.shape_cast %57 : vector<16xf32> to vector<16x1xf32>
    %59 = vector.extract_strided_slice %13 {offsets = [0, 56], sizes = [16, 8], strides = [1, 1]} : vector<16x64xf32> to vector<16x8xf32>
    %cst_23 = arith.constant dense<0.000000e+00> : vector<16xf32>
    %60 = vector.multi_reduction <add>, %59, %cst_23 [1] : vector<16x8xf32> to vector<16xf32>
    %61 = vector.shape_cast %60 : vector<16xf32> to vector<16x1xf32>
    %62 = vector.extract_strided_slice %16 {offsets = [0, 56], sizes = [16, 8], strides = [1, 1]} : vector<16x64xf32> to vector<16x8xf32>
    %cst_24 = arith.constant dense<0.000000e+00> : vector<16xf32>
    %63 = vector.multi_reduction <add>, %62, %cst_24 [1] : vector<16x8xf32> to vector<16xf32>
    %64 = vector.shape_cast %63 : vector<16xf32> to vector<16x1xf32>
    %65 = tpu.concatenate %19, %25, %31, %37, %43, %49, %55, %61 in 1 : vector<16x1xf32>, vector<16x1xf32>, vector<16x1xf32>, vector<16x1xf32>, vector<16x1xf32>, vector<16x1xf32>, vector<16x1xf32>, vector<16x1xf32> -> vector<16x8xf32>
    %66 = tpu.transpose %65, [1, 0] : vector<16x8xf32> -> vector<8x16xf32>
    %67 = vector.extract_strided_slice %66 {offsets = [0, 0], sizes = [1, 16], strides = [1, 1]} : vector<8x16xf32> to vector<1x16xf32>
    %68 = vector.broadcast %22 : vector<16x1xf32> to vector<16x16xf32>
    %69 = vector.broadcast %67 : vector<1x16xf32> to vector<16x16xf32>
    %70 = arith.addf %68, %69 : vector<16x16xf32>
    %cst_25 = arith.constant 0.000000e+00 : f32
    %71 = vector.broadcast %cst_25 : f32 to vector<16x16xf32>
    %72 = arith.cmpf oge, %70, %71 : vector<16x16xf32>
    %cst_26 = arith.constant 2.000000e-01 : f32
    %73 = vector.broadcast %cst_26 : f32 to vector<16x16xf32>
    %74 = arith.mulf %73, %70 : vector<16x16xf32>
    %75 = arith.select %72, %70, %74 : vector<16x16xi1>, vector<16x16xf32>
    %cst_27 = arith.constant -1.000000e+30 : f32
    %76 = vector.broadcast %cst_27 : f32 to vector<16x16xf32>
    %77 = arith.select %3, %75, %76 : vector<16x16xi1>, vector<16x16xf32>
    %cst_28 = arith.constant dense<0xFF800000> : vector<16xf32>
    %78 = vector.multi_reduction <maximumf>, %77, %cst_28 [1] : vector<16x16xf32> to vector<16xf32>
    %79 = vector.shape_cast %78 : vector<16xf32> to vector<16x1xf32>
    %80 = vector.broadcast %79 : vector<16x1xf32> to vector<16x16xf32>
    %81 = arith.subf %77, %80 : vector<16x16xf32>
    %82 = math.exp %81 : vector<16x16xf32>
    %83 = arith.mulf %82, %5 : vector<16x16xf32>
    %cst_29 = arith.constant dense<0.000000e+00> : vector<16xf32>
    %84 = vector.multi_reduction <add>, %83, %cst_29 [1] : vector<16x16xf32> to vector<16xf32>
    %85 = vector.shape_cast %84 : vector<16xf32> to vector<16x1xf32>
    %cst_30 = arith.constant 1.000000e-30 : f32
    %86 = vector.broadcast %cst_30 : f32 to vector<16x1xf32>
    %87 = arith.maximumf %85, %86 : vector<16x1xf32>
    %88 = vector.broadcast %87 : vector<16x1xf32> to vector<16x16xf32>
    %89 = arith.divf %83, %88 : vector<16x16xf32>
    %90 = vector.extract_strided_slice %10 {offsets = [0, 0], sizes = [16, 8], strides = [1, 1]} : vector<16x64xf32> to vector<16x8xf32>
    %cst_31 = arith.constant dense<0.000000e+00> : vector<16x8xf32>
    %91 = tpu.matmul %89, %90, %cst_31 {dimension_numbers = #tpu.dot_dimension_numbers<[1], [0], [0], [1], [0, 0, 1, 1], [], []>} : vector<16x16xf32>, vector<16x8xf32>, vector<16x8xf32> -> vector<16x8xf32>
    %cst_32 = arith.constant 0.000000e+00 : f32
    %92 = vector.broadcast %cst_32 : f32 to vector<16x8xf32>
    %93 = arith.cmpf ogt, %91, %92 : vector<16x8xf32>
    %cst_33 = arith.constant 0.000000e+00 : f32
    %94 = vector.broadcast %cst_33 : f32 to vector<16x8xf32>
    %95 = arith.minimumf %91, %94 : vector<16x8xf32>
    %96 = math.exp %95 : vector<16x8xf32>
    %cst_34 = arith.constant 1.000000e+00 : f32
    %97 = vector.broadcast %cst_34 : f32 to vector<16x8xf32>
    %98 = arith.subf %96, %97 : vector<16x8xf32>
    %99 = arith.select %93, %91, %98 : vector<16x8xi1>, vector<16x8xf32>
    %100 = vector.extract_strided_slice %66 {offsets = [1, 0], sizes = [1, 16], strides = [1, 1]} : vector<8x16xf32> to vector<1x16xf32>
    %101 = vector.broadcast %28 : vector<16x1xf32> to vector<16x16xf32>
    %102 = vector.broadcast %100 : vector<1x16xf32> to vector<16x16xf32>
    %103 = arith.addf %101, %102 : vector<16x16xf32>
    %cst_35 = arith.constant 0.000000e+00 : f32
    %104 = vector.broadcast %cst_35 : f32 to vector<16x16xf32>
    %105 = arith.cmpf oge, %103, %104 : vector<16x16xf32>
    %cst_36 = arith.constant 2.000000e-01 : f32
    %106 = vector.broadcast %cst_36 : f32 to vector<16x16xf32>
    %107 = arith.mulf %106, %103 : vector<16x16xf32>
    %108 = arith.select %105, %103, %107 : vector<16x16xi1>, vector<16x16xf32>
    %cst_37 = arith.constant -1.000000e+30 : f32
    %109 = vector.broadcast %cst_37 : f32 to vector<16x16xf32>
    %110 = arith.select %3, %108, %109 : vector<16x16xi1>, vector<16x16xf32>
    %cst_38 = arith.constant dense<0xFF800000> : vector<16xf32>
    %111 = vector.multi_reduction <maximumf>, %110, %cst_38 [1] : vector<16x16xf32> to vector<16xf32>
    %112 = vector.shape_cast %111 : vector<16xf32> to vector<16x1xf32>
    %113 = vector.broadcast %112 : vector<16x1xf32> to vector<16x16xf32>
    %114 = arith.subf %110, %113 : vector<16x16xf32>
    %115 = math.exp %114 : vector<16x16xf32>
    %116 = arith.mulf %115, %5 : vector<16x16xf32>
    %cst_39 = arith.constant dense<0.000000e+00> : vector<16xf32>
    %117 = vector.multi_reduction <add>, %116, %cst_39 [1] : vector<16x16xf32> to vector<16xf32>
    %118 = vector.shape_cast %117 : vector<16xf32> to vector<16x1xf32>
    %cst_40 = arith.constant 1.000000e-30 : f32
    %119 = vector.broadcast %cst_40 : f32 to vector<16x1xf32>
    %120 = arith.maximumf %118, %119 : vector<16x1xf32>
    %121 = vector.broadcast %120 : vector<16x1xf32> to vector<16x16xf32>
    %122 = arith.divf %116, %121 : vector<16x16xf32>
    %123 = vector.extract_strided_slice %10 {offsets = [0, 8], sizes = [16, 8], strides = [1, 1]} : vector<16x64xf32> to vector<16x8xf32>
    %cst_41 = arith.constant dense<0.000000e+00> : vector<16x8xf32>
    %124 = tpu.matmul %122, %123, %cst_41 {dimension_numbers = #tpu.dot_dimension_numbers<[1], [0], [0], [1], [0, 0, 1, 1], [], []>} : vector<16x16xf32>, vector<16x8xf32>, vector<16x8xf32> -> vector<16x8xf32>
    %cst_42 = arith.constant 0.000000e+00 : f32
    %125 = vector.broadcast %cst_42 : f32 to vector<16x8xf32>
    %126 = arith.cmpf ogt, %124, %125 : vector<16x8xf32>
    %cst_43 = arith.constant 0.000000e+00 : f32
    %127 = vector.broadcast %cst_43 : f32 to vector<16x8xf32>
    %128 = arith.minimumf %124, %127 : vector<16x8xf32>
    %129 = math.exp %128 : vector<16x8xf32>
    %cst_44 = arith.constant 1.000000e+00 : f32
    %130 = vector.broadcast %cst_44 : f32 to vector<16x8xf32>
    %131 = arith.subf %129, %130 : vector<16x8xf32>
    %132 = arith.select %126, %124, %131 : vector<16x8xi1>, vector<16x8xf32>
    %133 = vector.extract_strided_slice %66 {offsets = [2, 0], sizes = [1, 16], strides = [1, 1]} : vector<8x16xf32> to vector<1x16xf32>
    %134 = vector.broadcast %34 : vector<16x1xf32> to vector<16x16xf32>
    %135 = vector.broadcast %133 : vector<1x16xf32> to vector<16x16xf32>
    %136 = arith.addf %134, %135 : vector<16x16xf32>
    %cst_45 = arith.constant 0.000000e+00 : f32
    %137 = vector.broadcast %cst_45 : f32 to vector<16x16xf32>
    %138 = arith.cmpf oge, %136, %137 : vector<16x16xf32>
    %cst_46 = arith.constant 2.000000e-01 : f32
    %139 = vector.broadcast %cst_46 : f32 to vector<16x16xf32>
    %140 = arith.mulf %139, %136 : vector<16x16xf32>
    %141 = arith.select %138, %136, %140 : vector<16x16xi1>, vector<16x16xf32>
    %cst_47 = arith.constant -1.000000e+30 : f32
    %142 = vector.broadcast %cst_47 : f32 to vector<16x16xf32>
    %143 = arith.select %3, %141, %142 : vector<16x16xi1>, vector<16x16xf32>
    %cst_48 = arith.constant dense<0xFF800000> : vector<16xf32>
    %144 = vector.multi_reduction <maximumf>, %143, %cst_48 [1] : vector<16x16xf32> to vector<16xf32>
    %145 = vector.shape_cast %144 : vector<16xf32> to vector<16x1xf32>
    %146 = vector.broadcast %145 : vector<16x1xf32> to vector<16x16xf32>
    %147 = arith.subf %143, %146 : vector<16x16xf32>
    %148 = math.exp %147 : vector<16x16xf32>
    %149 = arith.mulf %148, %5 : vector<16x16xf32>
    %cst_49 = arith.constant dense<0.000000e+00> : vector<16xf32>
    %150 = vector.multi_reduction <add>, %149, %cst_49 [1] : vector<16x16xf32> to vector<16xf32>
    %151 = vector.shape_cast %150 : vector<16xf32> to vector<16x1xf32>
    %cst_50 = arith.constant 1.000000e-30 : f32
    %152 = vector.broadcast %cst_50 : f32 to vector<16x1xf32>
    %153 = arith.maximumf %151, %152 : vector<16x1xf32>
    %154 = vector.broadcast %153 : vector<16x1xf32> to vector<16x16xf32>
    %155 = arith.divf %149, %154 : vector<16x16xf32>
    %156 = vector.extract_strided_slice %10 {offsets = [0, 16], sizes = [16, 8], strides = [1, 1]} : vector<16x64xf32> to vector<16x8xf32>
    %cst_51 = arith.constant dense<0.000000e+00> : vector<16x8xf32>
    %157 = tpu.matmul %155, %156, %cst_51 {dimension_numbers = #tpu.dot_dimension_numbers<[1], [0], [0], [1], [0, 0, 1, 1], [], []>} : vector<16x16xf32>, vector<16x8xf32>, vector<16x8xf32> -> vector<16x8xf32>
    %cst_52 = arith.constant 0.000000e+00 : f32
    %158 = vector.broadcast %cst_52 : f32 to vector<16x8xf32>
    %159 = arith.cmpf ogt, %157, %158 : vector<16x8xf32>
    %cst_53 = arith.constant 0.000000e+00 : f32
    %160 = vector.broadcast %cst_53 : f32 to vector<16x8xf32>
    %161 = arith.minimumf %157, %160 : vector<16x8xf32>
    %162 = math.exp %161 : vector<16x8xf32>
    %cst_54 = arith.constant 1.000000e+00 : f32
    %163 = vector.broadcast %cst_54 : f32 to vector<16x8xf32>
    %164 = arith.subf %162, %163 : vector<16x8xf32>
    %165 = arith.select %159, %157, %164 : vector<16x8xi1>, vector<16x8xf32>
    %166 = vector.extract_strided_slice %66 {offsets = [3, 0], sizes = [1, 16], strides = [1, 1]} : vector<8x16xf32> to vector<1x16xf32>
    %167 = vector.broadcast %40 : vector<16x1xf32> to vector<16x16xf32>
    %168 = vector.broadcast %166 : vector<1x16xf32> to vector<16x16xf32>
    %169 = arith.addf %167, %168 : vector<16x16xf32>
    %cst_55 = arith.constant 0.000000e+00 : f32
    %170 = vector.broadcast %cst_55 : f32 to vector<16x16xf32>
    %171 = arith.cmpf oge, %169, %170 : vector<16x16xf32>
    %cst_56 = arith.constant 2.000000e-01 : f32
    %172 = vector.broadcast %cst_56 : f32 to vector<16x16xf32>
    %173 = arith.mulf %172, %169 : vector<16x16xf32>
    %174 = arith.select %171, %169, %173 : vector<16x16xi1>, vector<16x16xf32>
    %cst_57 = arith.constant -1.000000e+30 : f32
    %175 = vector.broadcast %cst_57 : f32 to vector<16x16xf32>
    %176 = arith.select %3, %174, %175 : vector<16x16xi1>, vector<16x16xf32>
    %cst_58 = arith.constant dense<0xFF800000> : vector<16xf32>
    %177 = vector.multi_reduction <maximumf>, %176, %cst_58 [1] : vector<16x16xf32> to vector<16xf32>
    %178 = vector.shape_cast %177 : vector<16xf32> to vector<16x1xf32>
    %179 = vector.broadcast %178 : vector<16x1xf32> to vector<16x16xf32>
    %180 = arith.subf %176, %179 : vector<16x16xf32>
    %181 = math.exp %180 : vector<16x16xf32>
    %182 = arith.mulf %181, %5 : vector<16x16xf32>
    %cst_59 = arith.constant dense<0.000000e+00> : vector<16xf32>
    %183 = vector.multi_reduction <add>, %182, %cst_59 [1] : vector<16x16xf32> to vector<16xf32>
    %184 = vector.shape_cast %183 : vector<16xf32> to vector<16x1xf32>
    %cst_60 = arith.constant 1.000000e-30 : f32
    %185 = vector.broadcast %cst_60 : f32 to vector<16x1xf32>
    %186 = arith.maximumf %184, %185 : vector<16x1xf32>
    %187 = vector.broadcast %186 : vector<16x1xf32> to vector<16x16xf32>
    %188 = arith.divf %182, %187 : vector<16x16xf32>
    %189 = vector.extract_strided_slice %10 {offsets = [0, 24], sizes = [16, 8], strides = [1, 1]} : vector<16x64xf32> to vector<16x8xf32>
    %cst_61 = arith.constant dense<0.000000e+00> : vector<16x8xf32>
    %190 = tpu.matmul %188, %189, %cst_61 {dimension_numbers = #tpu.dot_dimension_numbers<[1], [0], [0], [1], [0, 0, 1, 1], [], []>} : vector<16x16xf32>, vector<16x8xf32>, vector<16x8xf32> -> vector<16x8xf32>
    %cst_62 = arith.constant 0.000000e+00 : f32
    %191 = vector.broadcast %cst_62 : f32 to vector<16x8xf32>
    %192 = arith.cmpf ogt, %190, %191 : vector<16x8xf32>
    %cst_63 = arith.constant 0.000000e+00 : f32
    %193 = vector.broadcast %cst_63 : f32 to vector<16x8xf32>
    %194 = arith.minimumf %190, %193 : vector<16x8xf32>
    %195 = math.exp %194 : vector<16x8xf32>
    %cst_64 = arith.constant 1.000000e+00 : f32
    %196 = vector.broadcast %cst_64 : f32 to vector<16x8xf32>
    %197 = arith.subf %195, %196 : vector<16x8xf32>
    %198 = arith.select %192, %190, %197 : vector<16x8xi1>, vector<16x8xf32>
    %199 = vector.extract_strided_slice %66 {offsets = [4, 0], sizes = [1, 16], strides = [1, 1]} : vector<8x16xf32> to vector<1x16xf32>
    %200 = vector.broadcast %46 : vector<16x1xf32> to vector<16x16xf32>
    %201 = vector.broadcast %199 : vector<1x16xf32> to vector<16x16xf32>
    %202 = arith.addf %200, %201 : vector<16x16xf32>
    %cst_65 = arith.constant 0.000000e+00 : f32
    %203 = vector.broadcast %cst_65 : f32 to vector<16x16xf32>
    %204 = arith.cmpf oge, %202, %203 : vector<16x16xf32>
    %cst_66 = arith.constant 2.000000e-01 : f32
    %205 = vector.broadcast %cst_66 : f32 to vector<16x16xf32>
    %206 = arith.mulf %205, %202 : vector<16x16xf32>
    %207 = arith.select %204, %202, %206 : vector<16x16xi1>, vector<16x16xf32>
    %cst_67 = arith.constant -1.000000e+30 : f32
    %208 = vector.broadcast %cst_67 : f32 to vector<16x16xf32>
    %209 = arith.select %3, %207, %208 : vector<16x16xi1>, vector<16x16xf32>
    %cst_68 = arith.constant dense<0xFF800000> : vector<16xf32>
    %210 = vector.multi_reduction <maximumf>, %209, %cst_68 [1] : vector<16x16xf32> to vector<16xf32>
    %211 = vector.shape_cast %210 : vector<16xf32> to vector<16x1xf32>
    %212 = vector.broadcast %211 : vector<16x1xf32> to vector<16x16xf32>
    %213 = arith.subf %209, %212 : vector<16x16xf32>
    %214 = math.exp %213 : vector<16x16xf32>
    %215 = arith.mulf %214, %5 : vector<16x16xf32>
    %cst_69 = arith.constant dense<0.000000e+00> : vector<16xf32>
    %216 = vector.multi_reduction <add>, %215, %cst_69 [1] : vector<16x16xf32> to vector<16xf32>
    %217 = vector.shape_cast %216 : vector<16xf32> to vector<16x1xf32>
    %cst_70 = arith.constant 1.000000e-30 : f32
    %218 = vector.broadcast %cst_70 : f32 to vector<16x1xf32>
    %219 = arith.maximumf %217, %218 : vector<16x1xf32>
    %220 = vector.broadcast %219 : vector<16x1xf32> to vector<16x16xf32>
    %221 = arith.divf %215, %220 : vector<16x16xf32>
    %222 = vector.extract_strided_slice %10 {offsets = [0, 32], sizes = [16, 8], strides = [1, 1]} : vector<16x64xf32> to vector<16x8xf32>
    %cst_71 = arith.constant dense<0.000000e+00> : vector<16x8xf32>
    %223 = tpu.matmul %221, %222, %cst_71 {dimension_numbers = #tpu.dot_dimension_numbers<[1], [0], [0], [1], [0, 0, 1, 1], [], []>} : vector<16x16xf32>, vector<16x8xf32>, vector<16x8xf32> -> vector<16x8xf32>
    %cst_72 = arith.constant 0.000000e+00 : f32
    %224 = vector.broadcast %cst_72 : f32 to vector<16x8xf32>
    %225 = arith.cmpf ogt, %223, %224 : vector<16x8xf32>
    %cst_73 = arith.constant 0.000000e+00 : f32
    %226 = vector.broadcast %cst_73 : f32 to vector<16x8xf32>
    %227 = arith.minimumf %223, %226 : vector<16x8xf32>
    %228 = math.exp %227 : vector<16x8xf32>
    %cst_74 = arith.constant 1.000000e+00 : f32
    %229 = vector.broadcast %cst_74 : f32 to vector<16x8xf32>
    %230 = arith.subf %228, %229 : vector<16x8xf32>
    %231 = arith.select %225, %223, %230 : vector<16x8xi1>, vector<16x8xf32>
    %232 = vector.extract_strided_slice %66 {offsets = [5, 0], sizes = [1, 16], strides = [1, 1]} : vector<8x16xf32> to vector<1x16xf32>
    %233 = vector.broadcast %52 : vector<16x1xf32> to vector<16x16xf32>
    %234 = vector.broadcast %232 : vector<1x16xf32> to vector<16x16xf32>
    %235 = arith.addf %233, %234 : vector<16x16xf32>
    %cst_75 = arith.constant 0.000000e+00 : f32
    %236 = vector.broadcast %cst_75 : f32 to vector<16x16xf32>
    %237 = arith.cmpf oge, %235, %236 : vector<16x16xf32>
    %cst_76 = arith.constant 2.000000e-01 : f32
    %238 = vector.broadcast %cst_76 : f32 to vector<16x16xf32>
    %239 = arith.mulf %238, %235 : vector<16x16xf32>
    %240 = arith.select %237, %235, %239 : vector<16x16xi1>, vector<16x16xf32>
    %cst_77 = arith.constant -1.000000e+30 : f32
    %241 = vector.broadcast %cst_77 : f32 to vector<16x16xf32>
    %242 = arith.select %3, %240, %241 : vector<16x16xi1>, vector<16x16xf32>
    %cst_78 = arith.constant dense<0xFF800000> : vector<16xf32>
    %243 = vector.multi_reduction <maximumf>, %242, %cst_78 [1] : vector<16x16xf32> to vector<16xf32>
    %244 = vector.shape_cast %243 : vector<16xf32> to vector<16x1xf32>
    %245 = vector.broadcast %244 : vector<16x1xf32> to vector<16x16xf32>
    %246 = arith.subf %242, %245 : vector<16x16xf32>
    %247 = math.exp %246 : vector<16x16xf32>
    %248 = arith.mulf %247, %5 : vector<16x16xf32>
    %cst_79 = arith.constant dense<0.000000e+00> : vector<16xf32>
    %249 = vector.multi_reduction <add>, %248, %cst_79 [1] : vector<16x16xf32> to vector<16xf32>
    %250 = vector.shape_cast %249 : vector<16xf32> to vector<16x1xf32>
    %cst_80 = arith.constant 1.000000e-30 : f32
    %251 = vector.broadcast %cst_80 : f32 to vector<16x1xf32>
    %252 = arith.maximumf %250, %251 : vector<16x1xf32>
    %253 = vector.broadcast %252 : vector<16x1xf32> to vector<16x16xf32>
    %254 = arith.divf %248, %253 : vector<16x16xf32>
    %255 = vector.extract_strided_slice %10 {offsets = [0, 40], sizes = [16, 8], strides = [1, 1]} : vector<16x64xf32> to vector<16x8xf32>
    %cst_81 = arith.constant dense<0.000000e+00> : vector<16x8xf32>
    %256 = tpu.matmul %254, %255, %cst_81 {dimension_numbers = #tpu.dot_dimension_numbers<[1], [0], [0], [1], [0, 0, 1, 1], [], []>} : vector<16x16xf32>, vector<16x8xf32>, vector<16x8xf32> -> vector<16x8xf32>
    %cst_82 = arith.constant 0.000000e+00 : f32
    %257 = vector.broadcast %cst_82 : f32 to vector<16x8xf32>
    %258 = arith.cmpf ogt, %256, %257 : vector<16x8xf32>
    %cst_83 = arith.constant 0.000000e+00 : f32
    %259 = vector.broadcast %cst_83 : f32 to vector<16x8xf32>
    %260 = arith.minimumf %256, %259 : vector<16x8xf32>
    %261 = math.exp %260 : vector<16x8xf32>
    %cst_84 = arith.constant 1.000000e+00 : f32
    %262 = vector.broadcast %cst_84 : f32 to vector<16x8xf32>
    %263 = arith.subf %261, %262 : vector<16x8xf32>
    %264 = arith.select %258, %256, %263 : vector<16x8xi1>, vector<16x8xf32>
    %265 = vector.extract_strided_slice %66 {offsets = [6, 0], sizes = [1, 16], strides = [1, 1]} : vector<8x16xf32> to vector<1x16xf32>
    %266 = vector.broadcast %58 : vector<16x1xf32> to vector<16x16xf32>
    %267 = vector.broadcast %265 : vector<1x16xf32> to vector<16x16xf32>
    %268 = arith.addf %266, %267 : vector<16x16xf32>
    %cst_85 = arith.constant 0.000000e+00 : f32
    %269 = vector.broadcast %cst_85 : f32 to vector<16x16xf32>
    %270 = arith.cmpf oge, %268, %269 : vector<16x16xf32>
    %cst_86 = arith.constant 2.000000e-01 : f32
    %271 = vector.broadcast %cst_86 : f32 to vector<16x16xf32>
    %272 = arith.mulf %271, %268 : vector<16x16xf32>
    %273 = arith.select %270, %268, %272 : vector<16x16xi1>, vector<16x16xf32>
    %cst_87 = arith.constant -1.000000e+30 : f32
    %274 = vector.broadcast %cst_87 : f32 to vector<16x16xf32>
    %275 = arith.select %3, %273, %274 : vector<16x16xi1>, vector<16x16xf32>
    %cst_88 = arith.constant dense<0xFF800000> : vector<16xf32>
    %276 = vector.multi_reduction <maximumf>, %275, %cst_88 [1] : vector<16x16xf32> to vector<16xf32>
    %277 = vector.shape_cast %276 : vector<16xf32> to vector<16x1xf32>
    %278 = vector.broadcast %277 : vector<16x1xf32> to vector<16x16xf32>
    %279 = arith.subf %275, %278 : vector<16x16xf32>
    %280 = math.exp %279 : vector<16x16xf32>
    %281 = arith.mulf %280, %5 : vector<16x16xf32>
    %cst_89 = arith.constant dense<0.000000e+00> : vector<16xf32>
    %282 = vector.multi_reduction <add>, %281, %cst_89 [1] : vector<16x16xf32> to vector<16xf32>
    %283 = vector.shape_cast %282 : vector<16xf32> to vector<16x1xf32>
    %cst_90 = arith.constant 1.000000e-30 : f32
    %284 = vector.broadcast %cst_90 : f32 to vector<16x1xf32>
    %285 = arith.maximumf %283, %284 : vector<16x1xf32>
    %286 = vector.broadcast %285 : vector<16x1xf32> to vector<16x16xf32>
    %287 = arith.divf %281, %286 : vector<16x16xf32>
    %288 = vector.extract_strided_slice %10 {offsets = [0, 48], sizes = [16, 8], strides = [1, 1]} : vector<16x64xf32> to vector<16x8xf32>
    %cst_91 = arith.constant dense<0.000000e+00> : vector<16x8xf32>
    %289 = tpu.matmul %287, %288, %cst_91 {dimension_numbers = #tpu.dot_dimension_numbers<[1], [0], [0], [1], [0, 0, 1, 1], [], []>} : vector<16x16xf32>, vector<16x8xf32>, vector<16x8xf32> -> vector<16x8xf32>
    %cst_92 = arith.constant 0.000000e+00 : f32
    %290 = vector.broadcast %cst_92 : f32 to vector<16x8xf32>
    %291 = arith.cmpf ogt, %289, %290 : vector<16x8xf32>
    %cst_93 = arith.constant 0.000000e+00 : f32
    %292 = vector.broadcast %cst_93 : f32 to vector<16x8xf32>
    %293 = arith.minimumf %289, %292 : vector<16x8xf32>
    %294 = math.exp %293 : vector<16x8xf32>
    %cst_94 = arith.constant 1.000000e+00 : f32
    %295 = vector.broadcast %cst_94 : f32 to vector<16x8xf32>
    %296 = arith.subf %294, %295 : vector<16x8xf32>
    %297 = arith.select %291, %289, %296 : vector<16x8xi1>, vector<16x8xf32>
    %298 = vector.extract_strided_slice %66 {offsets = [7, 0], sizes = [1, 16], strides = [1, 1]} : vector<8x16xf32> to vector<1x16xf32>
    %299 = vector.broadcast %64 : vector<16x1xf32> to vector<16x16xf32>
    %300 = vector.broadcast %298 : vector<1x16xf32> to vector<16x16xf32>
    %301 = arith.addf %299, %300 : vector<16x16xf32>
    %cst_95 = arith.constant 0.000000e+00 : f32
    %302 = vector.broadcast %cst_95 : f32 to vector<16x16xf32>
    %303 = arith.cmpf oge, %301, %302 : vector<16x16xf32>
    %cst_96 = arith.constant 2.000000e-01 : f32
    %304 = vector.broadcast %cst_96 : f32 to vector<16x16xf32>
    %305 = arith.mulf %304, %301 : vector<16x16xf32>
    %306 = arith.select %303, %301, %305 : vector<16x16xi1>, vector<16x16xf32>
    %cst_97 = arith.constant -1.000000e+30 : f32
    %307 = vector.broadcast %cst_97 : f32 to vector<16x16xf32>
    %308 = arith.select %3, %306, %307 : vector<16x16xi1>, vector<16x16xf32>
    %cst_98 = arith.constant dense<0xFF800000> : vector<16xf32>
    %309 = vector.multi_reduction <maximumf>, %308, %cst_98 [1] : vector<16x16xf32> to vector<16xf32>
    %310 = vector.shape_cast %309 : vector<16xf32> to vector<16x1xf32>
    %311 = vector.broadcast %310 : vector<16x1xf32> to vector<16x16xf32>
    %312 = arith.subf %308, %311 : vector<16x16xf32>
    %313 = math.exp %312 : vector<16x16xf32>
    %314 = arith.mulf %313, %5 : vector<16x16xf32>
    %cst_99 = arith.constant dense<0.000000e+00> : vector<16xf32>
    %315 = vector.multi_reduction <add>, %314, %cst_99 [1] : vector<16x16xf32> to vector<16xf32>
    %316 = vector.shape_cast %315 : vector<16xf32> to vector<16x1xf32>
    %cst_100 = arith.constant 1.000000e-30 : f32
    %317 = vector.broadcast %cst_100 : f32 to vector<16x1xf32>
    %318 = arith.maximumf %316, %317 : vector<16x1xf32>
    %319 = vector.broadcast %318 : vector<16x1xf32> to vector<16x16xf32>
    %320 = arith.divf %314, %319 : vector<16x16xf32>
    %321 = vector.extract_strided_slice %10 {offsets = [0, 56], sizes = [16, 8], strides = [1, 1]} : vector<16x64xf32> to vector<16x8xf32>
    %cst_101 = arith.constant dense<0.000000e+00> : vector<16x8xf32>
    %322 = tpu.matmul %320, %321, %cst_101 {dimension_numbers = #tpu.dot_dimension_numbers<[1], [0], [0], [1], [0, 0, 1, 1], [], []>} : vector<16x16xf32>, vector<16x8xf32>, vector<16x8xf32> -> vector<16x8xf32>
    %cst_102 = arith.constant 0.000000e+00 : f32
    %323 = vector.broadcast %cst_102 : f32 to vector<16x8xf32>
    %324 = arith.cmpf ogt, %322, %323 : vector<16x8xf32>
    %cst_103 = arith.constant 0.000000e+00 : f32
    %325 = vector.broadcast %cst_103 : f32 to vector<16x8xf32>
    %326 = arith.minimumf %322, %325 : vector<16x8xf32>
    %327 = math.exp %326 : vector<16x8xf32>
    %cst_104 = arith.constant 1.000000e+00 : f32
    %328 = vector.broadcast %cst_104 : f32 to vector<16x8xf32>
    %329 = arith.subf %327, %328 : vector<16x8xf32>
    %330 = arith.select %324, %322, %329 : vector<16x8xi1>, vector<16x8xf32>
    %331 = tpu.concatenate %99, %132, %165, %198, %231, %264, %297, %330 in 1 : vector<16x8xf32>, vector<16x8xf32>, vector<16x8xf32>, vector<16x8xf32>, vector<16x8xf32>, vector<16x8xf32>, vector<16x8xf32>, vector<16x8xf32> -> vector<16x64xf32>
    %c0_105 = arith.constant 0 : index
    %c0_106 = arith.constant 0 : index
    %332 = vector.load %arg5[%c0_105, %c0_106] : memref<64x2xf32, #tpu.memory_space<vmem>>, vector<64x2xf32>
    %cst_107 = arith.constant dense<0.000000e+00> : vector<16x2xf32>
    %333 = tpu.matmul %331, %332, %cst_107 {dimension_numbers = #tpu.dot_dimension_numbers<[1], [0], [0], [1], [0, 0, 1, 1], [], []>} : vector<16x64xf32>, vector<64x2xf32>, vector<16x2xf32> -> vector<16x2xf32>
    %c0_108 = arith.constant 0 : index
    %c0_109 = arith.constant 0 : index
    %334 = vector.load %arg6[%c0_108, %c0_109] : memref<1x2xf32, #tpu.memory_space<vmem>>, vector<1x2xf32>
    %335 = vector.broadcast %334 : vector<1x2xf32> to vector<16x2xf32>
    %336 = arith.mulf %333, %335 : vector<16x2xf32>
    %c0_110 = arith.constant 0 : index
    %c0_111 = arith.constant 0 : index
    %337 = vector.load %arg7[%c0_110, %c0_111] : memref<1x2xf32, #tpu.memory_space<vmem>>, vector<1x2xf32>
    %338 = vector.broadcast %337 : vector<1x2xf32> to vector<16x2xf32>
    %339 = arith.mulf %333, %338 : vector<16x2xf32>
    %cst_112 = arith.constant 0.000000e+00 : f32
    %340 = vector.broadcast %cst_112 : f32 to vector<16x2xf32>
    %cst_113 = arith.constant dense<0.000000e+00> : vector<16xf32>
    %341 = vector.multi_reduction <add>, %336, %cst_113 [1] : vector<16x2xf32> to vector<16xf32>
    %342 = vector.shape_cast %341 : vector<16xf32> to vector<16x1xf32>
    %cst_114 = arith.constant dense<0.000000e+00> : vector<16xf32>
    %343 = vector.multi_reduction <add>, %339, %cst_114 [1] : vector<16x2xf32> to vector<16xf32>
    %344 = vector.shape_cast %343 : vector<16xf32> to vector<16x1xf32>
    %345 = tpu.transpose %342, [1, 0] : vector<16x1xf32> -> vector<1x16xf32>
    %346 = vector.broadcast %344 : vector<16x1xf32> to vector<16x16xf32>
    %347 = vector.broadcast %345 : vector<1x16xf32> to vector<16x16xf32>
    %348 = arith.addf %346, %347 : vector<16x16xf32>
    %cst_115 = arith.constant 0.000000e+00 : f32
    %349 = vector.broadcast %cst_115 : f32 to vector<16x16xf32>
    %350 = arith.cmpf oge, %348, %349 : vector<16x16xf32>
    %cst_116 = arith.constant 2.000000e-01 : f32
    %351 = vector.broadcast %cst_116 : f32 to vector<16x16xf32>
    %352 = arith.mulf %351, %348 : vector<16x16xf32>
    %353 = arith.select %350, %348, %352 : vector<16x16xi1>, vector<16x16xf32>
    %cst_117 = arith.constant -1.000000e+30 : f32
    %354 = vector.broadcast %cst_117 : f32 to vector<16x16xf32>
    %355 = arith.select %3, %353, %354 : vector<16x16xi1>, vector<16x16xf32>
    %cst_118 = arith.constant dense<0xFF800000> : vector<16xf32>
    %356 = vector.multi_reduction <maximumf>, %355, %cst_118 [1] : vector<16x16xf32> to vector<16xf32>
    %357 = vector.shape_cast %356 : vector<16xf32> to vector<16x1xf32>
    %358 = vector.broadcast %357 : vector<16x1xf32> to vector<16x16xf32>
    %359 = arith.subf %355, %358 : vector<16x16xf32>
    %360 = math.exp %359 : vector<16x16xf32>
    %361 = arith.mulf %360, %5 : vector<16x16xf32>
    %cst_119 = arith.constant dense<0.000000e+00> : vector<16xf32>
    %362 = vector.multi_reduction <add>, %361, %cst_119 [1] : vector<16x16xf32> to vector<16xf32>
    %363 = vector.shape_cast %362 : vector<16xf32> to vector<16x1xf32>
    %cst_120 = arith.constant 1.000000e-30 : f32
    %364 = vector.broadcast %cst_120 : f32 to vector<16x1xf32>
    %365 = arith.maximumf %363, %364 : vector<16x1xf32>
    %366 = vector.broadcast %365 : vector<16x1xf32> to vector<16x16xf32>
    %367 = arith.divf %361, %366 : vector<16x16xf32>
    %cst_121 = arith.constant dense<0.000000e+00> : vector<16x2xf32>
    %368 = tpu.matmul %367, %333, %cst_121 {dimension_numbers = #tpu.dot_dimension_numbers<[1], [0], [0], [1], [0, 0, 1, 1], [], []>} : vector<16x16xf32>, vector<16x2xf32>, vector<16x2xf32> -> vector<16x2xf32>
    %369 = arith.addf %340, %368 : vector<16x2xf32>
    %cst_122 = arith.constant 1.000000e+00 : f32
    %370 = vector.broadcast %cst_122 : f32 to vector<16x2xf32>
    %371 = arith.mulf %369, %370 : vector<16x2xf32>
    %c0_123 = arith.constant 0 : index
    %c0_124 = arith.constant 0 : index
    %372 = vector.load %arg8[%c0_123, %c0_124] : memref<16x2xf32, #tpu.memory_space<vmem>>, vector<16x2xf32>
    tpu.vector_store %arg8[%c0_123, %c0_124], %371 {strides = array<i32>} : memref<16x2xf32, #tpu.memory_space<vmem>>, vector<16x2xf32>,
    return
  }
}

</mosaic_0001>

<bundles_post_ra>
// kernel: tpu_custom_call.1
= control target key start
LH: loop header
LB: loop body
LE: loop exit
PB: predicated region body
PF: predicated region fallthrough
CT: control target
= control target key end

     0   :  { %v2164_v0 = vmov 0   ;;  %s2165_s13 = smov 120   ;;  %s2169_s14 = smov 88   ;;  %vm80_vm0 = vcmask 64512   ;;  %vm265_vm1 = vcmask 7168   ;;  %vm268_vm2 = vcmask 15360   ;;  %s2739_s0 = inlined_call_operand.vmem [shape: f32[16,1], index: 0, kind: input, shape index: {}]   ;;  %s2740_s2 = inlined_call_operand.vmem [shape: f32[1,64], index: 2, kind: input, shape index: {}]   ;;  %s2741_s3 = inlined_call_operand.vmem [shape: f32[1,64], index: 3, kind: input, shape index: {}]   ;;  %s2742_s4 = inlined_call_operand.vmem [shape: f32[1,64], index: 4, kind: input, shape index: {}]   ;;  %s2743_s1 = inlined_call_operand.vmem [shape: s8[16,16], index: 1, kind: input, shape index: {}]   ;;  %s2744_s5 = inlined_call_operand.vmem [shape: f32[64,2], index: 5, kind: input, shape index: {}]   ;;  %s2745_s6 = inlined_call_operand.vmem [shape: f32[1,2], index: 6, kind: input, shape index: {}]   ;;  %s2746_s7 = inlined_call_operand.vmem [shape: f32[1,2], index: 7, kind: input, shape index: {}]   ;;  %s2747_s8 = inlined_call_operand.vmem [shape: f32[16,2], index: 8, kind: output, shape index: {}]  }
   0x1   :  { %2024 = vset.pattern.permute.xlu0 %v2164_v0  ;;  %v41_v1 = vld [vmem:[%s2739_s0] sm:$0xff]  ;;  %v42_v2 = vld [vmem:[%s2739_s0 + $0x8] sm:$0xff]  ;;  %s2166_s0 = smov 112   ;;  %s2170_s15 = smov 80   ;;  %vm271_vm3 = vcmask 23552   ;;  %vm274_vm4 = vcmask 31744  }
   0x2   :  { %46 = vperm.xlu0 %2024, %v41_v1   ;;  %v1783_v3 = vld [vmem:[%s2740_s2] ss:$0 sm:$0xff]  ;;  %s2167_s2 = smov 104   ;;  %s2171_s16 = smov 72   ;;  %vm277_vm5 = vcmask 39936   ;;  %vm280_vm6 = vcmask 48128  }
   0x3   :  { %v1784_v5 = vld [vmem:[%s2741_s3] ss:$0 sm:$0xff]  ;;  %s2168_s3 = smov 96   ;;  %vm283_vm7 = vcmask 56320   ;;  %vm332_vm12 = vcmask 130048   ;;  %s2174_s20 = smov 8  }
   0x4   :  { %v1785_v13 = vld [vmem:[%s2742_s4] ss:$0 sm:$0xff]  ;;  %s2175_s29 = smov 32   ;;  %s2176_s30 = smov 24  }
   0x6   :  { %51 = vperm.xlu0 %2024, %v42_v2  }
  0x81   :  { %v47_v4 = vpop.permute.xlu0 %46 }
  0x82   :  { %v60_v6 = vmul.f32 %v1783_v3, %v47_v4 }
  0x84   :  { %v69_v7 = vmul.f32 %v1784_v5, %v60_v6  ;;  %v78_v14 = vmul.f32 %v1785_v13, %v60_v6 }
  0x85   :  { %v52_v8 = vpop.permute.xlu0 %51 }
  0x86   :  { %v61_v9 = vmul.f32 %v1783_v3, %v52_v8  ;;  %95 = vrot.lane.b32.xlu1 %v69_v7, %s2165_s13  ;;  %v81_v16 = vsel %vm80_vm0, %v69_v7, 0.0  ;;  %v87_v46 = vsel %vm80_vm0, %v78_v14, 0.0 }
  0x88   :  { %v1956_v10 = vpack.c.bf16 %v61_v9, %v60_v6  ;;  %v70_v11 = vmul.f32 %v1784_v5, %v61_v9  ;;  %v2238_v12 = vpack.i.bf16 %v61_v9, %v60_v6  ;;  %v2257_v15 = vmul.f32 %v1785_v13, %v61_v9 }
  0x8a   :  { %121 = vrot.lane.b32.xlu1 %v69_v7, %s2166_s0  ;;  %1957 = vmatprep.subr.bf16.mxu1 %v1956_v10  ;;  %v84_v17 = vsel %vm80_vm0, %v70_v11, 0.0  ;;  %v90_v50 = vsel %vm80_vm0, %v2257_v15, 0.0 }
  0x8b   :  { %97 = vrot.lane.b32.xlu0 %v70_v11, %s2165_s13  ;;  %1959 = vmatpush3.bf16.msra.mxu1 %v1956_v10 }
  0x8e   :  { %145 = vrot.lane.b32.xlu1 %v69_v7, %s2167_s2 }
  0x8f   :  { %123 = vrot.lane.b32.xlu0 %v70_v11, %s2166_s0 }
  0x92   :  { %169 = vrot.lane.b32.xlu1 %v69_v7, %s2168_s3 }
  0x93   :  { %147 = vrot.lane.b32.xlu0 %v70_v11, %s2167_s2 }
  0x96   :  { %193 = vrot.lane.b32.xlu1 %v69_v7, %s2169_s14 }
  0x97   :  { %171 = vrot.lane.b32.xlu0 %v70_v11, %s2168_s3 }
  0x9a   :  { %217 = vrot.lane.b32.xlu1 %v69_v7, %s2170_s15 }
  0x9b   :  { %195 = vrot.lane.b32.xlu0 %v70_v11, %s2169_s14 }
  0x9e   :  { %241 = vrot.lane.b32.xlu1 %v69_v7, %s2171_s16 }
  0x9f   :  { %219 = vrot.lane.b32.xlu0 %v70_v11, %s2170_s15 }
  0xa2   :  { %243 = vrot.lane.b32.xlu1 %v70_v11, %s2171_s16 }
  0xa3   :  { %109 = vrot.lane.b32.xlu0 %v78_v14, %s2165_s13 }
  0xa6   :  { %111 = vrot.lane.b32.xlu1 %v2257_v15, %s2165_s13 }
  0xa7   :  { %133 = vrot.lane.b32.xlu0 %v78_v14, %s2166_s0 }
  0xaa   :  { %135 = vrot.lane.b32.xlu1 %v2257_v15, %s2166_s0 }
  0xab   :  { %157 = vrot.lane.b32.xlu0 %v78_v14, %s2167_s2 }
  0xae   :  { %159 = vrot.lane.b32.xlu1 %v2257_v15, %s2167_s2 }
  0xaf   :  { %181 = vrot.lane.b32.xlu0 %v78_v14, %s2168_s3 }
  0xb2   :  { %183 = vrot.lane.b32.xlu1 %v2257_v15, %s2168_s3 }
  0xb3   :  { %205 = vrot.lane.b32.xlu0 %v78_v14, %s2169_s14 }
  0xb6   :  { %229 = vrot.lane.b32.xlu1 %v78_v14, %s2170_s15 }
  0xb7   :  { %207 = vrot.lane.b32.xlu0 %v2257_v15, %s2169_s14 }
  0xba   :  { %253 = vrot.lane.b32.xlu1 %v78_v14, %s2171_s16 }
  0xbb   :  { %231 = vrot.lane.b32.xlu0 %v2257_v15, %s2170_s15 }
  0xbf   :  { %255 = vrot.lane.b32.xlu0 %v2257_v15, %s2171_s16 }
  0xde   :  { %82 = vadd.xlane.f32.xlu1 %v81_v16 }
  0xe2   :  { %85 = vadd.xlane.f32.xlu1 %v84_v17 }
  0xf8   :  { %v96_v18 = vpop.permute.xlu1 %95 }
  0xf9   :  { %v101_v19 = vsel %vm80_vm0, %v96_v18, 0.0 }
  0xfa   :  { %102 = vadd.xlane.f32.xlu0 %v101_v19 }
  0xfc   :  { %v122_v20 = vpop.permute.xlu1 %121 }
  0xfd   :  { %v98_v21 = vpop.permute.xlu0 %97  ;;  %v127_v22 = vsel %vm80_vm0, %v122_v20, 0.0 }
  0xfe   :  { %128 = vadd.xlane.f32.xlu1 %v127_v22  ;;  %v104_v25 = vsel %vm80_vm0, %v98_v21, 0.0 }
 0x100   :  { %v146_v23 = vpop.permute.xlu1 %145 }
 0x101   :  { %v124_v24 = vpop.permute.xlu0 %123  ;;  %v151_v29 = vsel %vm80_vm0, %v146_v23, 0.0 }
 0x102   :  { %v130_v26 = vsel %vm80_vm0, %v124_v24, 0.0  ;;  %105 = vadd.xlane.f32.xlu1 %v104_v25 }
 0x103   :  { %131 = vadd.xlane.f32.xlu0 %v130_v26 }
 0x104   :  { %v170_v27 = vpop.permute.xlu1 %169 }
 0x105   :  { %v148_v28 = vpop.permute.xlu0 %147  ;;  %v175_v33 = vsel %vm80_vm0, %v170_v27, 0.0 }
 0x106   :  { %v154_v30 = vsel %vm80_vm0, %v148_v28, 0.0  ;;  %152 = vadd.xlane.f32.xlu1 %v151_v29 }
 0x107   :  { %155 = vadd.xlane.f32.xlu0 %v154_v30 }
 0x108   :  { %v194_v31 = vpop.permute.xlu1 %193 }
 0x109   :  { %v172_v32 = vpop.permute.xlu0 %171  ;;  %v199_v36 = vsel %vm80_vm0, %v194_v31, 0.0 }
 0x10a   :  { %176 = vadd.xlane.f32.xlu1 %v175_v33  ;;  %v178_v40 = vsel %vm80_vm0, %v172_v32, 0.0 }
 0x10c   :  { %v218_v34 = vpop.permute.xlu1 %217 }
 0x10d   :  { %v196_v35 = vpop.permute.xlu0 %195  ;;  %v223_v43 = vsel %vm80_vm0, %v218_v34, 0.0 }
 0x10e   :  { %v202_v37 = vsel %vm80_vm0, %v196_v35, 0.0  ;;  %200 = vadd.xlane.f32.xlu1 %v199_v36 }
 0x10f   :  { %203 = vadd.xlane.f32.xlu0 %v202_v37 }
 0x110   :  { %v242_v38 = vpop.permute.xlu1 %241 }
 0x111   :  { %v220_v39 = vpop.permute.xlu0 %219  ;;  %v247_v54 = vsel %vm80_vm0, %v242_v38, 0.0 }
 0x112   :  { %179 = vadd.xlane.f32.xlu1 %v178_v40  ;;  %v226_v58 = vsel %vm80_vm0, %v220_v39, 0.0 }
 0x114   :  { %v244_v41 = vpop.permute.xlu1 %243 }
 0x115   :  { %v110_v42 = vpop.permute.xlu0 %109  ;;  %v250_v62 = vsel %vm80_vm0, %v244_v41, 0.0 }
 0x116   :  { %224 = vadd.xlane.f32.xlu1 %v223_v43  ;;  %v115_v1 = vsel %vm80_vm0, %v110_v42, 0.0 }
 0x118   :  { %v112_v44 = vpop.permute.xlu1 %111 }
 0x119   :  { %v134_v45 = vpop.permute.xlu0 %133  ;;  %v118_v2 = vsel %vm80_vm0, %v112_v44, 0.0 }
 0x11a   :  { %v139_v47 = vsel %vm80_vm0, %v134_v45, 0.0  ;;  %88 = vadd.xlane.f32.xlu1 %v87_v46 }
 0x11b   :  { %140 = vadd.xlane.f32.xlu0 %v139_v47 }
 0x11c   :  { %v136_v48 = vpop.permute.xlu1 %135 }
 0x11d   :  { %v158_v49 = vpop.permute.xlu0 %157  ;;  %v142_v3 = vsel %vm80_vm0, %v136_v48, 0.0 }
 0x11e   :  { %v163_v51 = vsel %vm80_vm0, %v158_v49, 0.0  ;;  %91 = vadd.xlane.f32.xlu1 %v90_v50 }
 0x11f   :  { %164 = vadd.xlane.f32.xlu0 %v163_v51 }
 0x120   :  { %v160_v52 = vpop.permute.xlu1 %159 }
 0x121   :  { %v182_v53 = vpop.permute.xlu0 %181  ;;  %v166_v4 = vsel %vm80_vm0, %v160_v52, 0.0 }
 0x122   :  { %v187_v55 = vsel %vm80_vm0, %v182_v53, 0.0  ;;  %248 = vadd.xlane.f32.xlu1 %v247_v54  ;;  %v318_v53 = vlaneseq }
 0x123   :  { %188 = vadd.xlane.f32.xlu0 %v187_v55 }
 0x124   :  { %v184_v56 = vpop.permute.xlu1 %183 }
 0x125   :  { %v206_v57 = vpop.permute.xlu0 %205  ;;  %v190_v6 = vsel %vm80_vm0, %v184_v56, 0.0  ;;  %v1825_v56 = vld [vmem:[%s2743_s1] sm:$0xf]   ;;  %s2173_s1 = smov 16  }
 0x126   :  { %v211_v59 = vsel %vm80_vm0, %v206_v57, 0.0  ;;  %227 = vadd.xlane.f32.xlu1 %v226_v58  ;;  %v2339_v57 = vshrl.u32 %v318_v53, 7 }
 0x127   :  { %212 = vadd.xlane.f32.xlu0 %v211_v59 }
 0x128   :  { %v230_v60 = vpop.permute.xlu1 %229 }
 0x129   :  { %v235_v61 = vsel %vm80_vm0, %v230_v60, 0.0  ;;  %v208_v5 = vpop.permute.xlu0 %207  ;;  %v1826_v60 = vunpack.c.0.s8 %v1825_v56 }
 0x12a   :  { %251 = vadd.xlane.f32.xlu1 %v250_v62  ;;  %v214_v8 = vsel %vm80_vm0, %v208_v5, 0.0  ;;  %v320_v62 = vsub.s32 0, %v2339_v57 }
 0x12b   :  { %236 = vadd.xlane.f32.xlu0 %v235_v61  ;;  %v1827_v61 = vunpack.c.1.s8 %v1825_v56 }
 0x12c   :  { %v254_v63 = vpop.permute.xlu1 %253 }
 0x12d   :  { %v259_v0 = vsel %vm80_vm0, %v254_v63, 0.0  ;;  %v232_v7 = vpop.permute.xlu0 %231  ;;  %v1151_v63 = vsub.s32 6, %v2339_v57 }
 0x12e   :  { %116 = vadd.xlane.f32.xlu1 %v115_v1  ;;  %v238_v9 = vsel %vm80_vm0, %v232_v7, 0.0 }
 0x12f   :  { %260 = vadd.xlane.f32.xlu0 %v259_v0  ;;  %v454_v0 = vsub.s32 1, %v2339_v57 }
 0x131   :  { %v256_v10 = vpop.permute.xlu0 %255 }
 0x132   :  { %119 = vadd.xlane.f32.xlu1 %v118_v2  ;;  %v262_v11 = vsel %vm80_vm0, %v256_v10, 0.0  ;;  %v2350_v2 = vcvt.s32.f32 %v1826_v60 }
 0x134   :  { %vm35_vm8 = vcmp.gt.f32.partialorder %v2350_v2, 0.0 }
 0x136   :  { %143 = vadd.xlane.f32.xlu1 %v142_v3  ;;  %v2352_v3 = vcvt.s32.f32 %v1827_v61 }
 0x138   :  { %vm36_vm9 = vcmp.gt.f32.partialorder %v2352_v3, 0.0 }
 0x13a   :  { %167 = vadd.xlane.f32.xlu1 %v166_v4 }
 0x13e   :  { %191 = vadd.xlane.f32.xlu1 %v190_v6 }
 0x142   :  { %215 = vadd.xlane.f32.xlu1 %v214_v8  ;;  %v595_v8 = vsub.s32 2, %v2339_v57 }
 0x146   :  { %239 = vadd.xlane.f32.xlu1 %v238_v9 }
 0x14a   :  { %263 = vadd.xlane.f32.xlu1 %v262_v11 }
 0x16b   :  { %v83_v13 = vpop.xlane.xlu1 %82 }
 0x16f   :  { %v86_v14 = vpop.xlane.xlu1 %85 }
 0x187   :  { %v103_v22 = vpop.xlane.xlu0 %102 }
 0x188   :  { %v266_v25 = vsel %vm265_vm1, %v83_v13, %v103_v22 }
 0x18b   :  { %v129_v15 = vpop.xlane.xlu1 %128 }
 0x18c   :  { %v269_v26 = vsel %vm268_vm2, %v266_v25, %v129_v15 }
 0x18f   :  { %v106_v16 = vpop.xlane.xlu1 %105 }
 0x190   :  { %v132_v24 = vpop.xlane.xlu0 %131  ;;  %v267_v30 = vsel %vm265_vm1, %v86_v14, %v106_v16 }
 0x191   :  { %v270_v36 = vsel %vm268_vm2, %v267_v30, %v132_v24 }
 0x193   :  { %v153_v17 = vpop.xlane.xlu1 %152 }
 0x194   :  { %v272_v28 = vsel %vm271_vm3, %v269_v26, %v153_v17  ;;  %v156_v32 = vpop.xlane.xlu0 %155 }
 0x195   :  { %v273_v37 = vsel %vm271_vm3, %v270_v36, %v156_v32 }
 0x197   :  { %v177_v18 = vpop.xlane.xlu1 %176 }
 0x198   :  { %v275_v29 = vsel %vm274_vm4, %v272_v28, %v177_v18 }
 0x19b   :  { %v201_v19 = vpop.xlane.xlu1 %200 }
 0x19c   :  { %v278_v31 = vsel %vm277_vm5, %v275_v29, %v201_v19  ;;  %v204_v40 = vpop.xlane.xlu0 %203 }
 0x19f   :  { %v180_v20 = vpop.xlane.xlu1 %179 }
 0x1a0   :  { %v276_v38 = vsel %vm274_vm4, %v273_v37, %v180_v20 }
 0x1a1   :  { %v279_v41 = vsel %vm277_vm5, %v276_v38, %v204_v40 }
 0x1a3   :  { %v225_v21 = vpop.xlane.xlu1 %224 }
 0x1a4   :  { %v281_v33 = vsel %vm280_vm6, %v278_v31, %v225_v21  ;;  %v734_v31 = vsub.s32 3, %v2339_v57 }
 0x1a7   :  { %v89_v23 = vpop.xlane.xlu1 %88 }
 0x1a8   :  { %v141_v45 = vpop.xlane.xlu0 %140 }
 0x1ab   :  { %v92_v27 = vpop.xlane.xlu1 %91 }
 0x1ac   :  { %v2324_v47 = vpop.xlane.xlu0 %164 }
 0x1af   :  { %v249_v34 = vpop.xlane.xlu1 %248 }
 0x1b0   :  { %v284_v35 = vsel %vm283_vm7, %v281_v33, %v249_v34  ;;  %v2326_v49 = vpop.xlane.xlu0 %188  ;;  %v1290_v34 = vsub.s32 7, %v2339_v57 }
 0x1b1   :  { %286 = vxpose.xlu0.b32.start [1/2] (short) (narrow) %v284_v35, 8 }
 0x1b3   :  { %v228_v39 = vpop.xlane.xlu1 %227 }
 0x1b4   :  { %v282_v42 = vsel %vm280_vm6, %v279_v41, %v228_v39  ;;  %v2328_v51 = vpop.xlane.xlu0 %212 }
 0x1b7   :  { %v252_v43 = vpop.xlane.xlu1 %251 }
 0x1b8   :  { %v285_v44 = vsel %vm283_vm7, %v282_v42, %v252_v43  ;;  %v2332_v54 = vpop.xlane.xlu0 %236 }
 0x1b9   :  { %287 = vxpose.xlu0.b32.end [2/2] (short) (narrow) %v285_v44, 8 }
 0x1bb   :  { %v117_v46 = vpop.xlane.xlu1 %116 }
 0x1bc   :  { %v2341_v58 = vpop.xlane.xlu0 %260 }
 0x1bf   :  { %v120_v48 = vpop.xlane.xlu1 %119 }
 0x1c3   :  { %v144_v50 = vpop.xlane.xlu1 %143 }
 0x1c7   :  { %v2330_v52 = vpop.xlane.xlu1 %167 }
 0x1cb   :  { %v2334_v55 = vpop.xlane.xlu1 %191 }
 0x1cf   :  { %v2343_v59 = vpop.xlane.xlu1 %215 }
 0x1d3   :  { %v240_v7 = vpop.xlane.xlu1 %239 }
 0x235   :  { %v2348_v1 = vpop.trf.xlu0 }
 0x236   :  { %v321_v4 = vrot.slane %v2348_v1, %v320_v62  ;;  %v2358_v5 = vrot.slane %v2348_v1, %v1151_v63  ;;  %v455_v6 = vrot.slane %v2348_v1, %v454_v0  ;;  %v596_v17 = vrot.slane %v2348_v1, %v595_v8 }
 0x237   :  { %v735_v38 = vrot.slane %v2348_v1, %v734_v31  ;;  %v2398_v41 = vrot.slane %v2348_v1, %v1290_v34 }
 0x238   :  { %v322_v9 = vadd.f32 %v321_v4, %v89_v23  ;;  %v1154_v10 = vadd.f32 %v2358_v5, %v240_v7  ;;  %v323_v11 = vadd.f32 %v321_v4, %v92_v27  ;;  %v456_v13 = vadd.f32 %v455_v6, %v117_v46 }
 0x239   :  { %v457_v21 = vadd.f32 %v455_v6, %v120_v48  ;;  %v597_v30 = vadd.f32 %v596_v17, %v141_v45  ;;  %v598_v37 = vadd.f32 %v596_v17, %v144_v50  ;;  %v736_v44 = vadd.f32 %v735_v38, %v2324_v47 }
 0x23a   :  { %vm324_vm10 = vcmp.ge.f32.partialorder %v322_v9, 0.0  ;;  %v326_v14 = vmul.f32 0.2, %v322_v9  ;;  %vm1156_vm11 = vcmp.ge.f32.partialorder %v1154_v10, 0.0  ;;  %v1158_v15 = vmul.f32 0.2, %v1154_v10 }
 0x23b   :  { %vm325_vm13 = vcmp.ge.f32.partialorder %v323_v11, 0.0  ;;  %v327_v16 = vmul.f32 0.2, %v323_v11  ;;  %v460_v20 = vmul.f32 0.2, %v456_v13  ;;  %vm458_vm14 = vcmp.ge.f32.partialorder %v456_v13, 0.0 }
 0x23c   :  { %v328_v18 = vsel %vm324_vm10, %v322_v9, %v326_v14  ;;  %v1160_v19 = vsel %vm1156_vm11, %v1154_v10, %v1158_v15  ;;  %v461_v29 = vmul.f32 0.2, %v457_v21  ;;  %vm459_vm15 = vcmp.ge.f32.partialorder %v457_v21, 0.0 }
 0x23d   :  { %v2368_v22 = vsel %vm35_vm8, %v328_v18, -1e+30  ;;  %v2372_v23 = vsel %vm36_vm9, %v1160_v19, -1e+30  ;;  %v329_v24 = vsel %vm325_vm13, %v323_v11, %v327_v16  ;;  %v462_v28 = vsel %vm458_vm14, %v456_v13, %v460_v20 }
 0x23e   :  { %v333_v25 = vsel %vm332_vm12, %v2368_v22, -inf  ;;  %v1166_v26 = vsel %vm332_vm12, %v2372_v23, -inf  ;;  %v2380_v27 = vsel %vm36_vm9, %v329_v24, -1e+30  ;;  %v2387_v33 = vsel %vm35_vm8, %v462_v28, -1e+30 }
 0x23f   :  { %334 = vmax.xlane.f32.xlu1 %v333_v25  ;;  %1167 = vmax.xlane.f32.xlu0 %v1166_v26  ;;  %v336_v32 = vsel %vm332_vm12, %v2380_v27, -inf  ;;  %v463_v35 = vsel %vm459_vm15, %v457_v21, %v461_v29  ;;  %v601_v36 = vmul.f32 0.2, %v597_v30  ;;  %vm599_vm1 = vcmp.ge.f32.partialorder %v597_v30, 0.0 }
 0x240   :  { %v466_v39 = vsel %vm332_vm12, %v2387_v33, -inf  ;;  %v2395_v40 = vsel %vm36_vm9, %v463_v35, -1e+30  ;;  %v602_v43 = vmul.f32 0.2, %v598_v37  ;;  %v873_v45 = vsub.s32 4, %v2339_v57  ;;  %v264_v35 = vpop.xlane.xlu1 %263 }
 0x241   :  { %v603_v42 = vsel %vm599_vm1, %v597_v30, %v601_v36  ;;  %vm600_vm3 = vcmp.ge.f32.partialorder %v598_v37, 0.0  ;;  %v469_v46 = vsel %vm332_vm12, %v2395_v40, -inf  ;;  %v2410_v50 = vadd.f32 %v2398_v41, %v2341_v58 }
 0x242   :  { %v2406_v48 = vsel %vm35_vm8, %v603_v42, -1e+30  ;;  %v604_v53 = vsel %vm600_vm3, %v598_v37, %v602_v43  ;;  %v740_v56 = vmul.f32 0.2, %v736_v44  ;;  %v737_v60 = vadd.f32 %v735_v38, %v2330_v52 }
 0x243   :  { %337 = vmax.xlane.f32.xlu1 %v336_v32  ;;  %v874_v47 = vrot.slane %v2348_v1, %v873_v45  ;;  %vm738_vm4 = vcmp.ge.f32.partialorder %v736_v44, 0.0  ;;  %v607_v61 = vsel %vm332_vm12, %v2406_v48, -inf  ;;  %v2418_v63 = vsel %vm36_vm9, %v604_v53, -1e+30 }
 0x244   :  { %v742_v0 = vsel %vm738_vm4, %v736_v44, %v740_v56  ;;  %v741_v4 = vmul.f32 0.2, %v737_v60  ;;  %v1012_v6 = vsub.s32 5, %v2339_v57  ;;  %vm739_vm5 = vcmp.ge.f32.partialorder %v737_v60, 0.0 }
 0x245   :  { %v875_v58 = vadd.f32 %v874_v47, %v2326_v49  ;;  %v610_v52 = vsel %vm332_vm12, %v2418_v63, -inf  ;;  %v2426_v7 = vsel %vm35_vm8, %v742_v0, -1e+30  ;;  %v876_v10 = vadd.f32 %v874_v47, %v2334_v55 }
 0x246   :  { %v743_v8 = vsel %vm739_vm5, %v737_v60, %v741_v4  ;;  %v1013_v11 = vrot.slane %v2348_v1, %v1012_v6  ;;  %v746_v49 = vsel %vm332_vm12, %v2426_v7, -inf  ;;  %v1153_v25 = vadd.f32 %v2358_v5, %v2332_v54 }
 0x247   :  { %467 = vmax.xlane.f32.xlu1 %v466_v39  ;;  %v879_v9 = vmul.f32 0.2, %v875_v58  ;;  %vm877_vm6 = vcmp.ge.f32.partialorder %v875_v58, 0.0  ;;  %v2436_v13 = vsel %vm36_vm9, %v743_v8, -1e+30  ;;  %vm878_vm7 = vcmp.ge.f32.partialorder %v876_v10, 0.0 }
 0x248   :  { %v880_v15 = vmul.f32 0.2, %v876_v10  ;;  %v1014_v16 = vadd.f32 %v1013_v11, %v2328_v51  ;;  %v749_v55 = vsel %vm332_vm12, %v2436_v13, -inf  ;;  %v1015_v19 = vadd.f32 %v1013_v11, %v2343_v59 }
 0x249   :  { %v881_v14 = vsel %vm877_vm6, %v875_v58, %v879_v9  ;;  %v1157_v29 = vmul.f32 0.2, %v1153_v25  ;;  %vm1155_vm13 = vcmp.ge.f32.partialorder %v1153_v25, 0.0  ;;  %v1296_v36 = vmul.f32 0.2, %v2410_v50 }
 0x24a   :  { %v2445_v1 = vsel %vm35_vm8, %v881_v14, -1e+30  ;;  %v882_v17 = vsel %vm878_vm7, %v876_v10, %v880_v15  ;;  %v1018_v18 = vmul.f32 0.2, %v1014_v16  ;;  %vm1016_vm10 = vcmp.ge.f32.partialorder %v1014_v16, 0.0 }
 0x24b   :  { %470 = vmax.xlane.f32.xlu1 %v469_v46  ;;  %v885_v51 = vsel %vm332_vm12, %v2445_v1, -inf  ;;  %v2452_v20 = vsel %vm36_vm9, %v882_v17, -1e+30  ;;  %v1019_v24 = vmul.f32 0.2, %v1015_v19  ;;  %vm1017_vm11 = vcmp.ge.f32.partialorder %v1015_v19, 0.0 }
 0x24c   :  { %v1020_v21 = vsel %vm1016_vm10, %v1014_v16, %v1018_v18  ;;  %v888_v26 = vsel %vm332_vm12, %v2452_v20, -inf  ;;  %v1159_v54 = vsel %vm1155_vm13, %v1153_v25, %v1157_v29  ;;  %v1293_v37 = vadd.f32 %v2398_v41, %v264_v35 }
 0x24d   :  { %v2460_v59 = vsel %vm35_vm8, %v1020_v21, -1e+30  ;;  %v1021_v28 = vsel %vm1017_vm11, %v1015_v19, %v1019_v24  ;;  %v2472_v32 = vsel %vm35_vm8, %v1159_v54, -1e+30  ;;  %vm1294_vm14 = vcmp.ge.f32.partialorder %v2410_v50, 0.0 }
 0x24e   :  { %v1024_v30 = vsel %vm332_vm12, %v2460_v59, -inf  ;;  %v2466_v31 = vsel %vm36_vm9, %v1021_v28, -1e+30  ;;  %v1163_v34 = vsel %vm332_vm12, %v2472_v32, -inf  ;;  %v1298_v38 = vsel %vm1294_vm14, %v2410_v50, %v1296_v36 }
 0x24f   :  { %608 = vmax.xlane.f32.xlu1 %v607_v61  ;;  %v1027_v5 = vsel %vm332_vm12, %v2466_v31, -inf  ;;  %v1297_v39 = vmul.f32 0.2, %v1293_v37  ;;  %vm1295_vm15 = vcmp.ge.f32.partialorder %v1293_v37, 0.0  ;;  %v2486_v42 = vsel %vm35_vm8, %v1298_v38, -1e+30 }
 0x250   :  { %v1302_v44 = vsel %vm332_vm12, %v2486_v42, -inf  ;;  %v2172_v11 = vmov 0.0  }
 0x251   :  { %v1299_v43 = vsel %vm1295_vm15, %v1293_v37, %v1297_v39  ;;  %v2514_v18 = vsel %vm36_vm9, 1.0, %v2172_v11 }
 0x252   :  { %v2492_v45 = vsel %vm36_vm9, %v1299_v43, -1e+30 }
 0x253   :  { %611 = vmax.xlane.f32.xlu1 %v610_v52  ;;  %v1305_v41 = vsel %vm332_vm12, %v2492_v45, -inf }
 0x255   :  { %2031 = vrot.lane.b32.xlu0 %v2238_v12, %s2166_s0 }
 0x257   :  { %747 = vmax.xlane.f32.xlu1 %v746_v49  ;;  %v2506_v49 = vsel %vm35_vm8, 1.0, %v2172_v11 }
 0x259   :  { %2046 = vrot.lane.b32.xlu0 %v2238_v12, %s2169_s14  ;;  %s2177_s14 = smov 48  }
 0x25b   :  { %750 = vmax.xlane.f32.xlu1 %v749_v55 }
 0x25f   :  { %886 = vmax.xlane.f32.xlu1 %v885_v51 }
 0x263   :  { %889 = vmax.xlane.f32.xlu1 %v888_v26 }
 0x267   :  { %1025 = vmax.xlane.f32.xlu1 %v1024_v30 }
 0x26b   :  { %1028 = vmax.xlane.f32.xlu1 %v1027_v5 }
 0x26f   :  { %1164 = vmax.xlane.f32.xlu1 %v1163_v34 }
 0x280   :  { %2026 = vrot.lane.b32.xlu1 %v2238_v12, %s2165_s13 }
 0x284   :  { %2036 = vrot.lane.b32.xlu1 %v2238_v12, %s2167_s2 }
 0x2a8   :  { %1303 = vmax.xlane.f32.xlu1 %v1302_v44 }
 0x2ac   :  { %1306 = vmax.xlane.f32.xlu1 %v1305_v41 }
 0x2bd   :  { %2041 = vrot.lane.b32.xlu1 %v2238_v12, %s2168_s3 }
 0x2cc   :  { %v2498_v46 = vpop.xlane.xlu0 %1167  ;;  %v335_v50 = vpop.xlane.xlu1 %334 }
 0x2cd   :  { %v339_v53 = vsub.f32 %v2368_v22, %v335_v50 }
 0x2cf   :  { %v341_v56 = vmul.f32 1.442695, %v339_v53 }
 0x2d0   :  { %v2032_v60 = vpop.permute.xlu0 %2031  ;;  %v338_v47 = vpop.xlane.xlu1 %337 }
 0x2d1   :  { %v2034_v61 = vunpack.i.h.bf16 %v2032_v60  ;;  %v2033_v0 = vunpack.i.l.bf16 %v2032_v60  ;;  %v340_v4 = vsub.f32 %v2380_v27, %v338_v47  ;;  %2060 = vpow2.f32 %v341_v56 }
 0x2d3   :  { %v343_v58 = vmul.f32 1.442695, %v340_v4  ;;  %v1964_v6 = vpack.c.bf16 %v2034_v61, %v2033_v0  ;;  %v1170_v61 = vsub.f32 %v2372_v23, %v2498_v46 }
 0x2d4   :  { %v468_v52 = vpop.xlane.xlu1 %467 }
 0x2d5   :  { %2062 = vpow2.f32 %v343_v58  ;;  %v472_v8 = vsub.f32 %v2387_v33, %v468_v52  ;;  %1965 = vmatprep.subr.bf16.mxu0 %v1964_v6 }
 0x2d6   :  { %1967 = vmatpush3.bf16.msra.mxu0 %v1964_v6 }
 0x2d7   :  { %v474_v9 = vmul.f32 1.442695, %v472_v8 }
 0x2d8   :  { %v471_v10 = vpop.xlane.xlu1 %470 }
 0x2d9   :  { %2064 = vpow2.f32 %v474_v9  ;;  %v473_v22 = vsub.f32 %v2395_v40, %v471_v10 }
 0x2db   :  { %v476_v27 = vmul.f32 1.442695, %v473_v22  ;;  %v2061_v14 = vpop.eup %2060 }
 0x2dc   :  { %v609_v15 = vpop.xlane.xlu1 %608  ;;  %v2510_v33 = vmul.f32 %v2061_v14, %v2506_v49 }
 0x2dd   :  { %2066 = vpow2.f32 %v476_v27  ;;  %v613_v16 = vsub.f32 %v2406_v48, %v609_v15 }
 0x2de   :  { %v347_v19 = vsel %vm332_vm12, %v2510_v33, 0.0 }
 0x2df   :  { %v2063_v55 = vpop.eup %2062  ;;  %v615_v17 = vmul.f32 1.442695, %v613_v16 }
 0x2e0   :  { %v612_v40 = vpop.xlane.xlu1 %611  ;;  %v2519_v51 = vmul.f32 %v2063_v55, %v2514_v18 }
 0x2e1   :  { %2068 = vpow2.f32 %v615_v17  ;;  %v614_v21 = vsub.f32 %v2418_v63, %v612_v40  ;;  %348 = vadd.xlane.f32.xlu1 %v347_v19 }
 0x2e2   :  { %v350_v26 = vsel %vm332_vm12, %v2519_v51, 0.0 }
 0x2e3   :  { %v2065_v48 = vpop.eup %2064  ;;  %v617_v24 = vmul.f32 1.442695, %v614_v21 }
 0x2e4   :  { %v748_v25 = vpop.xlane.xlu1 %747  ;;  %v2525_v28 = vmul.f32 %v2065_v48, %v2506_v49 }
 0x2e5   :  { %2070 = vpow2.f32 %v617_v24  ;;  %v752_v29 = vsub.f32 %v2426_v7, %v748_v25  ;;  %351 = vadd.xlane.f32.xlu1 %v350_v26 }
 0x2e6   :  { %v480_v63 = vsel %vm332_vm12, %v2525_v28, 0.0 }
 0x2e7   :  { %v2067_v30 = vpop.eup %2066  ;;  %v754_v54 = vmul.f32 1.442695, %v752_v29 }
 0x2e8   :  { %v751_v5 = vpop.xlane.xlu1 %750  ;;  %v2531_v34 = vmul.f32 %v2067_v30, %v2514_v18 }
 0x2e9   :  { %2072 = vpow2.f32 %v754_v54  ;;  %v753_v35 = vsub.f32 %v2436_v13, %v751_v5  ;;  %481 = vadd.xlane.f32.xlu1 %v480_v63 }
 0x2ea   :  { %v483_v7 = vsel %vm332_vm12, %v2531_v34, 0.0 }
 0x2eb   :  { %v2069_v36 = vpop.eup %2068  ;;  %v756_v37 = vmul.f32 1.442695, %v753_v35 }
 0x2ec   :  { %v887_v38 = vpop.xlane.xlu1 %886  ;;  %v2537_v39 = vmul.f32 %v2069_v36, %v2506_v49 }
 0x2ed   :  { %2074 = vpow2.f32 %v756_v37  ;;  %v891_v43 = vsub.f32 %v2445_v1, %v887_v38  ;;  %484 = vadd.xlane.f32.xlu1 %v483_v7 }
 0x2ee   :  { %v621_v13 = vsel %vm332_vm12, %v2537_v39, 0.0 }
 0x2ef   :  { %v2071_v44 = vpop.eup %2070  ;;  %v893_v41 = vmul.f32 1.442695, %v891_v43 }
 0x2f0   :  { %v890_v50 = vpop.xlane.xlu1 %889  ;;  %v2543_v53 = vmul.f32 %v2071_v44, %v2514_v18 }
 0x2f1   :  { %2076 = vpow2.f32 %v893_v41  ;;  %v892_v56 = vsub.f32 %v2452_v20, %v890_v50  ;;  %622 = vadd.xlane.f32.xlu1 %v621_v13  ;;  %v1173_v20 = vmul.f32 1.442695, %v1170_v61 }
 0x2f2   :  { %v624_v0 = vsel %vm332_vm12, %v2543_v53, 0.0 }
 0x2f3   :  { %v2073_v60 = vpop.eup %2072  ;;  %v895_v47 = vmul.f32 1.442695, %v892_v56 }
 0x2f4   :  { %v1026_v1 = vpop.xlane.xlu1 %1025  ;;  %v2551_v4 = vmul.f32 %v2073_v60, %v2506_v49 }
 0x2f5   :  { %2078 = vpow2.f32 %v895_v47  ;;  %v1030_v58 = vsub.f32 %v2460_v59, %v1026_v1  ;;  %625 = vadd.xlane.f32.xlu1 %v624_v0 }
 0x2f6   :  { %v760_v9 = vsel %vm332_vm12, %v2551_v4, 0.0 }
 0x2f7   :  { %v2075_v6 = vpop.eup %2074  ;;  %v1032_v52 = vmul.f32 1.442695, %v1030_v58 }
 0x2f8   :  { %v1029_v8 = vpop.xlane.xlu1 %1028  ;;  %v2557_v23 = vmul.f32 %v2075_v6, %v2514_v18 }
 0x2f9   :  { %2080 = vpow2.f32 %v1032_v52  ;;  %v1031_v46 = vsub.f32 %v2466_v31, %v1029_v8  ;;  %761 = vadd.xlane.f32.xlu1 %v760_v9 }
 0x2fa   :  { %2082 = vpow2.f32 %v1173_v20  ;;  %v763_v59 = vsel %vm332_vm12, %v2557_v23, 0.0 }
 0x2fb   :  { %v2077_v10 = vpop.eup %2076  ;;  %v1034_v22 = vmul.f32 1.442695, %v1031_v46 }
 0x2fc   :  { %v1165_v11 = vpop.xlane.xlu1 %1164  ;;  %v2563_v27 = vmul.f32 %v2077_v10, %v2506_v49 }
 0x2fd   :  { %2084 = vpow2.f32 %v1034_v22  ;;  %v1169_v14 = vsub.f32 %v2472_v32, %v1165_v11  ;;  %764 = vadd.xlane.f32.xlu1 %v763_v59 }
 0x2fe   :  { %v899_v31 = vsel %vm332_vm12, %v2563_v27, 0.0 }
 0x2ff   :  { %v2079_v15 = vpop.eup %2078  ;;  %v1171_v16 = vmul.f32 1.442695, %v1169_v14 }
 0x300   :  { %v2027_v55 = vpop.permute.xlu1 %2026  ;;  %v2569_v17 = vmul.f32 %v2079_v15, %v2514_v18 }
 0x301   :  { %2086 = vpow2.f32 %v1171_v16  ;;  %v2029_v40 = vunpack.i.h.bf16 %v2027_v55  ;;  %v2028_v19 = vunpack.i.l.bf16 %v2027_v55  ;;  %900 = vadd.xlane.f32.xlu1 %v899_v31 }
 0x302   :  { %v902_v21 = vsel %vm332_vm12, %v2569_v17, 0.0 }
 0x303   :  { %v2081_v48 = vpop.eup %2080  ;;  %v2573_v24 = vpack.c.bf16 %v2029_v40, %v2028_v19  ;;  %903 = vadd.xlane.f32.xlu0 %v902_v21 }
 0x304   :  { %v2576_v32 = vmul.f32 %v2081_v48, %v2506_v49  ;;  %v2083_v25 = vpop.eup %2082  ;;  %v2037_v38 = vpop.permute.xlu1 %2036 }
 0x305   :  { %1961 = vmatprep.subr.bf16.mxu1 %v2573_v24  ;;  %v2587_v5 = vmul.f32 %v2083_v25, %v2514_v18  ;;  %v2039_v15 = vunpack.i.h.bf16 %v2037_v38  ;;  %v2038_v16 = vunpack.i.l.bf16 %v2037_v38  ;;  %v2047_v25 = vpop.permute.xlu0 %2046 }
 0x306   :  { %v1038_v26 = vsel %vm332_vm12, %v2576_v32, 0.0 }
 0x307   :  { %v2085_v29 = vpop.eup %2084  ;;  %1039 = vadd.xlane.f32.xlu1 %v1038_v26  ;;  %v1180_v36 = vsel %vm332_vm12, %v2587_v5, 0.0  ;;  %v1968_v19 = vpack.c.bf16 %v2039_v15, %v2038_v16 }
 0x308   :  { %v2582_v30 = vmul.f32 %v2085_v29, %v2514_v18  ;;  %v2049_v29 = vunpack.i.h.bf16 %v2047_v25 }
 0x30a   :  { %v1041_v54 = vsel %vm332_vm12, %v2582_v30, 0.0 }
 0x30b   :  { %v2087_v63 = vpop.eup %2086  ;;  %1042 = vadd.xlane.f32.xlu0 %v1041_v54  ;;  %v2048_v54 = vunpack.i.l.bf16 %v2047_v25 }
 0x30c   :  { %v2590_v35 = vmul.f32 %v2087_v63, %v2506_v49 }
 0x30d   :  { %v1976_v38 = vpack.c.bf16 %v2049_v29, %v2048_v54 }
 0x30e   :  { %v1177_v37 = vsel %vm332_vm12, %v2590_v35, 0.0 }
 0x30f   :  { %1181 = vadd.xlane.f32.xlu0 %v1180_v36  ;;  %1178 = vadd.xlane.f32.xlu1 %v1177_v37 }
 0x335   :  { %v1304_v7 = vpop.xlane.xlu1 %1303 }
 0x336   :  { %v1308_v43 = vsub.f32 %v2486_v42, %v1304_v7 }
 0x338   :  { %v1310_v44 = vmul.f32 1.442695, %v1308_v43 }
 0x339   :  { %v1307_v41 = vpop.xlane.xlu1 %1306 }
 0x33a   :  { %2088 = vpow2.f32 %v1310_v44  ;;  %v1309_v50 = vsub.f32 %v2492_v45, %v1307_v41 }
 0x33c   :  { %v1312_v13 = vmul.f32 1.442695, %v1309_v50 }
 0x33d   :  { %v2042_v56 = vpop.permute.xlu1 %2041 }
 0x33e   :  { %2090 = vpow2.f32 %v1312_v13  ;;  %v2044_v60 = vunpack.i.h.bf16 %v2042_v56  ;;  %v2043_v47 = vunpack.i.l.bf16 %v2042_v56 }
 0x340   :  { %v2598_v61 = vpack.c.bf16 %v2044_v60, %v2043_v47 }
 0x342   :  { %1973 = vmatprep.subr.bf16.mxu0 %v2598_v61 }
 0x344   :  { %v2089_v1 = vpop.eup %2088 }
 0x345   :  { %v2602_v0 = vmul.f32 %v2089_v1, %v2506_v49 }
 0x347   :  { %v1316_v42 = vsel %vm332_vm12, %v2602_v0, 0.0 }
 0x348   :  { %v2091_v58 = vpop.eup %2090  ;;  %1317 = vadd.xlane.f32.xlu1 %v1316_v42 }
 0x349   :  { %v2607_v45 = vmul.f32 %v2091_v58, %v2514_v18 }
 0x34b   :  { %v1319_v6 = vsel %vm332_vm12, %v2607_v45, 0.0 }
 0x34c   :  { %1320 = vadd.xlane.f32.xlu0 %v1319_v6 }
 0x359   :  { %2051 = vrot.lane.b32.xlu1 %v2238_v12, %s2170_s15  ;;  %s2179_s15 = smov 56  }
 0x362   :  { %2056 = vrot.lane.b32.xlu0 %v2238_v12, %s2171_s16 }
 0x36e   :  { %v349_v52 = vpop.xlane.xlu1 %348 }
 0x36f   :  { %v353_v20 = vmax.f32 %v349_v52, 1e-30 }
 0x371   :  { %2092 = vrcp.f32 %v353_v20 }
 0x372   :  { %v352_v8 = vpop.xlane.xlu1 %351 }
 0x373   :  { %v354_v9 = vmax.f32 %v352_v8, 1e-30 }
 0x375   :  { %2094 = vrcp.f32 %v354_v9 }
 0x376   :  { %v482_v46 = vpop.xlane.xlu1 %481 }
 0x377   :  { %v486_v10 = vmax.f32 %v482_v46, 1e-30 }
 0x379   :  { %2096 = vrcp.f32 %v486_v10 }
 0x37a   :  { %v485_v22 = vpop.xlane.xlu1 %484 }
 0x37b   :  { %v2093_v11 = vpop.eup %2092  ;;  %v487_v59 = vmax.f32 %v485_v22, 1e-30 }
 0x37c   :  { %v356_v14 = vmul.f32 %v2093_v11, %v2510_v33 }
 0x37d   :  { %2098 = vrcp.f32 %v487_v59 }
 0x37e   :  { %1878 = vmatprep.mubr.msk.f32.mxu1 %vm332_vm12, %v356_v14  ;;  %v623_v12 = vpop.xlane.xlu1 %622 }
 0x37f   :  { %v2095_v55 = vpop.eup %2094  ;;  %v627_v31 = vmax.f32 %v623_v12, 1e-30 }
 0x380   :  { %v358_v40 = vmul.f32 %v2095_v55, %v2519_v51 }
 0x381   :  { %2100 = vrcp.f32 %v627_v31 }
 0x382   :  { %1879 = vmatmul.mubr.msk.f32.vlgmr.msra.gmra.mrb[0].mxu1 %vm332_vm12, %v358_v40  ;;  %v626_v21 = vpop.xlane.xlu1 %625 }
 0x383   :  { %v2097_v48 = vpop.eup %2096  ;;  %v628_v26 = vmax.f32 %v626_v21, 1e-30  ;;  %1963 = vmatpush3.bf16.msra.mxu1 %v2573_v24 }
 0x384   :  { %1969 = vmatprep.subr.bf16.mxu1 %v1968_v19  ;;  %v489_v33 = vmul.f32 %v2097_v48, %v2525_v28 }
 0x385   :  { %2102 = vrcp.f32 %v628_v26 }
 0x386   :  { %1885 = vmatprep.mubr.msk.f32.mxu1 %vm332_vm12, %v489_v33  ;;  %v762_v63 = vpop.xlane.xlu1 %761 }
 0x387   :  { %v2099_v51 = vpop.eup %2098  ;;  %v766_v36 = vmax.f32 %v762_v63, 1e-30 }
 0x388   :  { %v491_v37 = vmul.f32 %v2099_v51, %v2531_v34 }
 0x389   :  { %2104 = vrcp.f32 %v766_v36 }
 0x38a   :  { %v765_v7 = vpop.xlane.xlu1 %764  ;;  %1886 = vmatmul.mubr.msk.f32.vlgmr.msra.gmra.mrb[2].mxu1 %vm332_vm12, %v491_v37 }
 0x38b   :  { %v2101_v43 = vpop.eup %2100  ;;  %v767_v24 = vmax.f32 %v765_v7, 1e-30  ;;  %1971 = vmatpush3.bf16.msra.mxu1 %v1968_v19 }
 0x38c   :  { %1977 = vmatprep.subr.bf16.mxu1 %v1976_v38  ;;  %v630_v28 = vmul.f32 %v2101_v43, %v2537_v39 }
 0x38d   :  { %2106 = vrcp.f32 %v767_v24 }
 0x38e   :  { %1892 = vmatprep.mubr.msk.f32.mxu0 %vm332_vm12, %v630_v28  ;;  %v901_v44 = vpop.xlane.xlu1 %900 }
 0x38f   :  { %v2103_v41 = vpop.eup %2102  ;;  %v905_v50 = vmax.f32 %v901_v44, 1e-30 }
 0x390   :  { %v904_v13 = vpop.xlane.xlu0 %903  ;;  %v632_v34 = vmul.f32 %v2103_v41, %v2543_v53 }
 0x391   :  { %2108 = vrcp.f32 %v905_v50  ;;  %v906_v56 = vmax.f32 %v904_v13, 1e-30 }
 0x392   :  { %1893 = vmatmul.mubr.msk.f32.vlgmr.msra.gmra.mrb[0].mxu0 %vm332_vm12, %v632_v34 }
 0x393   :  { %v2105_v60 = vpop.eup %2104  ;;  %2110 = vrcp.f32 %v906_v56  ;;  %1975 = vmatpush3.bf16.msra.mxu0 %v2598_v61 }
 0x394   :  { %v1040_v47 = vpop.xlane.xlu1 %1039  ;;  %v769_v39 = vmul.f32 %v2105_v60, %v2551_v4 }
 0x395   :  { %v1044_v1 = vmax.f32 %v1040_v47, 1e-30 }
 0x396   :  { %1899 = vmatprep.mubr.msk.f32.mxu1 %vm332_vm12, %v769_v39 }
 0x397   :  { %v2107_v42 = vpop.eup %2106  ;;  %2112 = vrcp.f32 %v1044_v1 }
 0x398   :  { %v1043_v58 = vpop.xlane.xlu0 %1042  ;;  %v771_v6 = vmul.f32 %v2107_v42, %v2557_v23 }
 0x399   :  { %v1045_v53 = vmax.f32 %v1043_v58, 1e-30 }
 0x39a   :  { %1900 = vmatmul.mubr.msk.f32.vlgmr.msra.gmra.mrb[4].mxu1 %vm332_vm12, %v771_v6 }
 0x39b   :  { %v2109_v52 = vpop.eup %2108  ;;  %2114 = vrcp.f32 %v1045_v53  ;;  %1979 = vmatpush3.bf16.msra.mxu1 %v1976_v38 }
 0x39c   :  { %v1179_v20 = vpop.xlane.xlu1 %1178  ;;  %v908_v61 = vmul.f32 %v2109_v52, %v2563_v27  ;;  %v1182_v59 = vpop.xlane.xlu0 %1181 }
 0x39d   :  { %v2111_v8 = vpop.eup %2110  ;;  %v1183_v9 = vmax.f32 %v1179_v20, 1e-30 }
 0x39e   :  { %1906 = vmatprep.mubr.msk.f32.mxu0 %vm332_vm12, %v908_v61  ;;  %v910_v4 = vmul.f32 %v2111_v8, %v2569_v17  ;;  %v1184_v17 = vmax.f32 %v1182_v59, 1e-30 }
 0x39f   :  { %2116 = vrcp.f32 %v1183_v9 }
 0x3a0   :  { %1907 = vmatmul.mubr.msk.f32.vlgmr.msra.gmra.mrb[2].mxu0 %vm332_vm12, %v910_v4  ;;  %2118 = vrcp.f32 %v1184_v17 }
 0x3a1   :  { %v2113_v46 = vpop.eup %2112 }
 0x3a2   :  { %v1047_v23 = vmul.f32 %v2113_v46, %v2576_v32 }
 0x3a4   :  { %1913 = vmatprep.mubr.msk.f32.mxu1 %vm332_vm12, %v1047_v23 }
 0x3a5   :  { %v2115_v10 = vpop.eup %2114 }
 0x3a6   :  { %v1049_v22 = vmul.f32 %v2115_v10, %v2582_v30 }
 0x3a8   :  { %1914 = vmatmul.mubr.msk.f32.vlgmr.msra.gmra.mrb[6].mxu1 %vm332_vm12, %v1049_v22 }
 0x3a9   :  { %v2117_v27 = vpop.eup %2116 }
 0x3aa   :  { %v1186_v11 = vmul.f32 %v2117_v27, %v2590_v35  ;;  %v2119_v40 = vpop.eup %2118 }
 0x3ab   :  { %v1188_v25 = vmul.f32 %v2119_v40, %v2587_v5 }
 0x3ac   :  { %1920 = vmatprep.mubr.msk.f32.mxu0 %vm332_vm12, %v1186_v11 }
 0x3d5   :  { %v1318_v14 = vpop.xlane.xlu1 %1317 }
 0x3d6   :  { %v1322_v15 = vmax.f32 %v1318_v14, 1e-30  ;;  %v1502_v14 = vld [vmem:[%s2744_s5] sm:$0xff] }
 0x3d8   :  { %2120 = vrcp.f32 %v1322_v15  ;;  %v1503_v15 = vld [vmem:[%s2744_s5 + $0x8] sm:$0xff] }
 0x3d9   :  { %v1321_v16 = vpop.xlane.xlu0 %1320  ;;  %v2052_v32 = vpop.permute.xlu1 %2051 }
 0x3da   :  { %v1323_v12 = vmax.f32 %v1321_v16, 1e-30  ;;  %v2054_v55 = vunpack.i.h.bf16 %v2052_v32  ;;  %v2053_v31 = vunpack.i.l.bf16 %v2052_v32  ;;  %v1504_v16 = vld [vmem:[%s2744_s5 + $0x10] sm:$0xff] }
 0x3dc   :  { %2122 = vrcp.f32 %v1323_v12  ;;  %v1980_v30 = vpack.c.bf16 %v2054_v55, %v2053_v31  ;;  %v1988_v12 = vpack.c.bf16 %v1503_v15, %v1502_v14  ;;  %v1505_v55 = vld [vmem:[%s2744_s5 + $0x18] sm:$0xff] }
 0x3dd   :  { %v2057_v19 = vpop.permute.xlu0 %2056 }
 0x3de   :  { %v2059_v21 = vunpack.i.h.bf16 %v2057_v19  ;;  %v2058_v48 = vunpack.i.l.bf16 %v2057_v19  ;;  %1981 = vmatprep.subr.bf16.mxu0 %v1980_v30 }
 0x3df   :  { %1983 = vmatpush3.bf16.msra.mxu0 %v1980_v30  ;;  %v1992_v30 = vpack.c.bf16 %v1505_v55, %v1504_v16 }
 0x3e0   :  { %v1984_v35 = vpack.c.bf16 %v2059_v21, %v2058_v48  ;;  %1989 = vmatprep.subr.bf16.mxu0 %v1988_v12 }
 0x3e2   :  { %v2121_v26 = vpop.eup %2120  ;;  %1921 = vmatmul.mubr.msk.f32.vlgmr.msra.gmra.mrb[4].mxu0 %vm332_vm12, %v1188_v25  ;;  %1985 = vmatprep.subr.bf16.mxu1 %v1984_v35 }
 0x3e3   :  { %1987 = vmatpush3.bf16.msra.mxu1 %v1984_v35  ;;  %v1325_v33 = vmul.f32 %v2121_v26, %v2602_v0  ;;  %1991 = vmatpush3.bf16.msra.mxu0 %v1988_v12 }
 0x3e4   :  { %1993 = vmatprep.subr.bf16.mxu0 %v1992_v30 }
 0x3e5   :  { %1927 = vmatprep.mubr.msk.f32.mxu1 %vm332_vm12, %v1325_v33 }
 0x3e6   :  { %v2123_v29 = vpop.eup %2122 }
 0x3e7   :  { %v1327_v54 = vmul.f32 %v2123_v29, %v2607_v45  ;;  %1995 = vmatpush3.bf16.msra.mxu0 %v1992_v30 }
 0x3e9   :  { %1928 = vmatmul.mubr.msk.f32.vlgmr.msra.gmra.mrb[8].mxu1 %vm332_vm12, %v1327_v54 }
 0x455   :  { %v2649_v63 = vpop.f32.mrb[0].mxu1 }
 0x456   :  { %v2651_v51 = vpop.f32.mrb[1].mxu1  ;;  %v443_v55 = vmin.f32 %v2649_v63, 0.0 }
 0x457   :  { %v442_v12 = vmin.f32 %v2651_v51, 0.0 }
 0x45d   :  { %v1887_v36 = vpop.f32.mrb[2].mxu1 }
 0x45e   :  { %v572_v5 = vpop.f32.mrb[3].mxu1  ;;  %v584_v37 = vmin.f32 %v1887_v36, 0.0  ;;  %vm582_vm4 = vcmp.gt.f32.partialorder %v1887_v36, 0.0 }
 0x45f   :  { %v583_v38 = vmin.f32 %v572_v5, 0.0  ;;  %vm581_vm5 = vcmp.gt.f32.partialorder %v572_v5, 0.0 }
 0x460   :  { %v587_v7 = vmul.f32 1.442695, %v584_v37 }
 0x461   :  { %v585_v43 = vmul.f32 1.442695, %v583_v38 }
 0x462   :  { %2124 = vpow2.f32 %v587_v7 }
 0x463   :  { %2126 = vpow2.f32 %v585_v43 }
 0x465   :  { %v1894_v24 = vpop.f32.mrb[0].mxu0 }
 0x466   :  { %v723_v28 = vmin.f32 %v1894_v24, 0.0  ;;  %v711_v0 = vpop.f32.mrb[1].mxu0  ;;  %vm721_vm1 = vcmp.gt.f32.partialorder %v1894_v24, 0.0 }
 0x467   :  { %v722_v44 = vmin.f32 %v711_v0, 0.0  ;;  %vm720_vm3 = vcmp.gt.f32.partialorder %v711_v0, 0.0 }
 0x468   :  { %v726_v41 = vmul.f32 1.442695, %v723_v28 }
 0x469   :  { %v724_v45 = vmul.f32 1.442695, %v722_v44 }
 0x46a   :  { %2128 = vpow2.f32 %v726_v41  ;;  %v1506_v41 = vld [vmem:[%s2744_s5 + $0x20] sm:$0xff] }
 0x46b   :  { %2130 = vpow2.f32 %v724_v45  ;;  %v1507_v45 = vld [vmem:[%s2744_s5 + $0x28] sm:$0xff] }
 0x46c   :  { %v2125_v60 = vpop.eup %2124 }
 0x46d   :  { %v2653_v50 = vpop.f32.mrb[4].mxu1  ;;  %v2127_v39 = vpop.eup %2126  ;;  %v1793_v23 = vadd.f32 -1.0, %v2125_v60 }
 0x46e   :  { %v862_v13 = vmin.f32 %v2653_v50, 0.0  ;;  %v2656_v34 = vpop.f32.mrb[5].mxu1  ;;  %v1792_v10 = vadd.f32 -1.0, %v2127_v39  ;;  %vm860_vm10 = vcmp.gt.f32.partialorder %v2653_v50, 0.0 }
 0x46f   :  { %v861_v56 = vmin.f32 %v2656_v34, 0.0  ;;  %v592_v11 = vsel %vm582_vm4, %v1887_v36, %v1793_v23  ;;  %vm859_vm11 = vcmp.gt.f32.partialorder %v2656_v34, 0.0 }
 0x470   :  { %v865_v47 = vmul.f32 1.442695, %v862_v13  ;;  %v591_v17 = vsel %vm581_vm5, %v572_v5, %v1792_v10  ;;  %v1996_v13 = vpack.c.bf16 %v1507_v45, %v1506_v41  ;;  %vm440_vm5 = vcmp.gt.f32.partialorder %v2651_v51, 0.0 }
 0x471   :  { %v863_v1 = vmul.f32 1.442695, %v861_v56 }
 0x472   :  { %2132 = vpow2.f32 %v865_v47  ;;  %1997 = vmatprep.subr.bf16.mxu0 %v1996_v13 }
 0x473   :  { %v1908_v42 = vpop.f32.mrb[2].mxu0  ;;  %2134 = vpow2.f32 %v863_v1  ;;  %1999 = vmatpush3.bf16.msra.mxu0 %v1996_v13  ;;  %v1508_v1 = vld [vmem:[%s2744_s5 + $0x30] sm:$0xff] }
 0x474   :  { %v2129_v58 = vpop.eup %2128  ;;  %v1001_v6 = vmin.f32 %v1908_v42, 0.0  ;;  %v989_v53 = vpop.f32.mrb[3].mxu0  ;;  %vm999_vm6 = vcmp.gt.f32.partialorder %v1908_v42, 0.0 }
 0x475   :  { %v2131_v52 = vpop.eup %2130  ;;  %v1000_v20 = vmin.f32 %v989_v53, 0.0  ;;  %v1797_v61 = vadd.f32 -1.0, %v2129_v58  ;;  %vm998_vm7 = vcmp.gt.f32.partialorder %v989_v53, 0.0 }
 0x476   :  { %v1796_v8 = vadd.f32 -1.0, %v2131_v52  ;;  %v1004_v9 = vmul.f32 1.442695, %v1001_v6 }
 0x477   :  { %v1002_v4 = vmul.f32 1.442695, %v1000_v20  ;;  %v731_v46 = vsel %vm721_vm1, %v1894_v24, %v1797_v61 }
 0x478   :  { %2136 = vpow2.f32 %v1004_v9  ;;  %1439 = vrot.lane.b32.xlu0 %v731_v46, %s2173_s1  ;;  %v730_v22 = vsel %vm720_vm3, %v711_v0, %v1796_v8 }
 0x479   :  { %2138 = vpow2.f32 %v1002_v4  ;;  %1437 = vrot.lane.b32.xlu1 %v730_v22, %s2173_s1 }
 0x47b   :  { %v2659_v27 = vpop.f32.mrb[6].mxu1 }
 0x47c   :  { %1431 = vrot.lane.b32.xlu0 %v592_v11, %s2174_s20  ;;  %v2661_v59 = vpop.f32.mrb[7].mxu1  ;;  %v2133_v32 = vpop.eup %2132  ;;  %v1140_v36 = vmin.f32 %v2659_v27, 0.0  ;;  %vm1138_vm15 = vcmp.gt.f32.partialorder %v2659_v27, 0.0 }
 0x47d   :  { %1429 = vrot.lane.b32.xlu1 %v591_v17, %s2174_s20  ;;  %v2135_v31 = vpop.eup %2134  ;;  %v1801_v25 = vadd.f32 -1.0, %v2133_v32  ;;  %v1139_v5 = vmin.f32 %v2661_v59, 0.0  ;;  %vm1137_vm1 = vcmp.gt.f32.partialorder %v2661_v59, 0.0 }
 0x47e   :  { %v1800_v26 = vadd.f32 -1.0, %v2135_v31  ;;  %v1143_v37 = vmul.f32 1.442695, %v1140_v36  ;;  %v446_v31 = vmul.f32 1.442695, %v443_v55 }
 0x47f   :  { %v870_v29 = vsel %vm860_vm10, %v2653_v50, %v1801_v25  ;;  %v1141_v38 = vmul.f32 1.442695, %v1139_v5  ;;  %vm1490_vm10 = vcmask 261120  }
 0x480   :  { %v869_v54 = vsel %vm859_vm11, %v2656_v34, %v1800_v26  ;;  %2140 = vpow2.f32 %v1143_v37  ;;  %vm1493_vm11 = vcmask 326656  }
 0x481   :  { %2142 = vpow2.f32 %v1141_v38 }
 0x482   :  { %v2137_v40 = vpop.eup %2136 }
 0x483   :  { %v2139_v19 = vpop.eup %2138  ;;  %v1805_v21 = vadd.f32 -1.0, %v2137_v40 }
 0x484   :  { %v1804_v48 = vadd.f32 -1.0, %v2139_v19 }
 0x485   :  { %v1009_v35 = vsel %vm999_vm6, %v1908_v42, %v1805_v21  ;;  %v1509_v42 = vld [vmem:[%s2744_s5 + $0x38] sm:$0xff]  ;;  %s2178_s5 = smov 40   ;;  %vm441_vm6 = vcmp.gt.f32.partialorder %v2649_v63, 0.0 }
 0x486   :  { %1455 = vrot.lane.b32.xlu0 %v1009_v35, %s2175_s29  ;;  %v1008_v33 = vsel %vm998_vm7, %v989_v53, %v1804_v48  ;;  %v2000_v58 = vpack.c.bf16 %v1509_v42, %v1508_v1  ;;  %vm1487_vm7 = vcmask 195584   ;;  %v1820_v42 = vld [vmem:[%s2745_s6] ss:$0 sm:$0xff] }
 0x487   :  { %1453 = vrot.lane.b32.xlu1 %v1008_v33, %s2175_s29 }
 0x488   :  { %2001 = vmatprep.subr.bf16.mxu0 %v2000_v58 }
 0x489   :  { %2003 = vmatpush3.bf16.msra.mxu0 %v2000_v58 }
 0x48a   :  { %1447 = vrot.lane.b32.xlu0 %v870_v29, %s2176_s30  ;;  %v2141_v6 = vpop.eup %2140 }
 0x48b   :  { %1445 = vrot.lane.b32.xlu1 %v869_v54, %s2176_s30  ;;  %v2143_v53 = vpop.eup %2142  ;;  %v1809_v4 = vadd.f32 -1.0, %v2141_v6  ;;  %v1821_v6 = vld [vmem:[%s2746_s7] ss:$0 sm:$0xff] }
 0x48c   :  { %v1808_v46 = vadd.f32 -1.0, %v2143_v53 }
 0x48d   :  { %v1148_v22 = vsel %vm1138_vm15, %v2659_v27, %v1809_v4  ;;  %v444_v27 = vmul.f32 1.442695, %v442_v12 }
 0x48e   :  { %v1147_v17 = vsel %vm1137_vm1, %v2661_v59, %v1808_v46 }
 0x4b5   :  { %v1922_v7 = vpop.f32.mrb[4].mxu0 }
 0x4b6   :  { %v1279_v43 = vmin.f32 %v1922_v7, 0.0  ;;  %v1267_v24 = vpop.f32.mrb[5].mxu0  ;;  %vm1277_vm13 = vcmp.gt.f32.partialorder %v1922_v7, 0.0 }
 0x4b7   :  { %v1278_v28 = vmin.f32 %v1267_v24, 0.0  ;;  %vm1276_vm14 = vcmp.gt.f32.partialorder %v1267_v24, 0.0 }
 0x4b8   :  { %v1282_v0 = vmul.f32 1.442695, %v1279_v43 }
 0x4b9   :  { %v1280_v44 = vmul.f32 1.442695, %v1278_v28 }
 0x4ba   :  { %2144 = vpow2.f32 %v1282_v0 }
 0x4bb   :  { %2146 = vpow2.f32 %v1280_v44 }
 0x4bc   :  { %v1929_v50 = vpop.f32.mrb[8].mxu1 }
 0x4bd   :  { %v1418_v34 = vmin.f32 %v1929_v50, 0.0  ;;  %v1406_v56 = vpop.f32.mrb[9].mxu1  ;;  %vm1416_vm3 = vcmp.gt.f32.partialorder %v1929_v50, 0.0 }
 0x4be   :  { %v1417_v60 = vmin.f32 %v1406_v56, 0.0  ;;  %vm1415_vm4 = vcmp.gt.f32.partialorder %v1406_v56, 0.0 }
 0x4bf   :  { %v1421_v47 = vmul.f32 1.442695, %v1418_v34 }
 0x4c0   :  { %v1419_v39 = vmul.f32 1.442695, %v1417_v60 }
 0x4c1   :  { %2148 = vpow2.f32 %v1421_v47 }
 0x4c2   :  { %2150 = vpow2.f32 %v1419_v39 }
 0x4c3   :  { %2152 = vpow2.f32 %v444_v27 }
 0x4c4   :  { %v2145_v52 = vpop.eup %2144  ;;  %2154 = vpow2.f32 %v446_v31 }
 0x4c5   :  { %v2147_v20 = vpop.eup %2146  ;;  %v1813_v61 = vadd.f32 -1.0, %v2145_v52 }
 0x4c6   :  { %v1812_v8 = vadd.f32 -1.0, %v2147_v20 }
 0x4c7   :  { %v1287_v9 = vsel %vm1277_vm13, %v1922_v7, %v1813_v61  ;;  %vm1496_vm13 = vcmask 392192  }
 0x4c8   :  { %1471 = vrot.lane.b32.xlu0 %v1287_v9, %s2177_s14  ;;  %v1286_v23 = vsel %vm1276_vm14, %v1267_v24, %v1812_v8  ;;  %vm1499_vm14 = vcmask 457728  }
 0x4c9   :  { %1469 = vrot.lane.b32.xlu1 %v1286_v23, %s2177_s14 }
 0x4cb   :  { %v2149_v10 = vpop.eup %2148 }
 0x4cc   :  { %v2151_v11 = vpop.eup %2150  ;;  %1463 = vrot.lane.b32.xlu0 %v1148_v22, %s2178_s5  ;;  %v1817_v14 = vadd.f32 -1.0, %v2149_v10 }
 0x4cd   :  { %v1816_v15 = vadd.f32 -1.0, %v2151_v11  ;;  %1461 = vrot.lane.b32.xlu1 %v1147_v17, %s2178_s5  ;;  %v2153_v21 = vpop.eup %2152 }
 0x4ce   :  { %v1426_v16 = vsel %vm1416_vm3, %v1929_v50, %v1817_v14  ;;  %v2155_v35 = vpop.eup %2154  ;;  %v1788_v26 = vadd.f32 -1.0, %v2153_v21 }
 0x4cf   :  { %v1425_v32 = vsel %vm1415_vm4, %v1406_v56, %v1816_v15  ;;  %v1789_v33 = vadd.f32 -1.0, %v2155_v35 }
 0x4d0   :  { %1479 = vrot.lane.b32.xlu0 %v1426_v16, %s2179_s15  ;;  %v450_v54 = vsel %vm440_vm5, %v2651_v51, %v1788_v26 }
 0x4d1   :  { %1477 = vrot.lane.b32.xlu1 %v1425_v32, %s2179_s15  ;;  %v451_v5 = vsel %vm441_vm6, %v2649_v63, %v1789_v33 }
 0x4ea   :  { %v1440_v30 = vpop.permute.xlu0 %1439 }
 0x4eb   :  { %v1438_v59 = vpop.permute.xlu1 %1437 }
 0x4ee   :  { %v1432_v40 = vpop.permute.xlu0 %1431 }
 0x4ef   :  { %v1430_v19 = vpop.permute.xlu1 %1429  ;;  %v1484_v38 = vsel %vm80_vm0, %v451_v5, %v1432_v40 }
 0x4f0   :  { %v1483_v37 = vsel %vm80_vm0, %v450_v54, %v1430_v19  ;;  %v1486_v28 = vsel %vm332_vm12, %v1484_v38, %v1440_v30  ;;  %vm1510_vm0 = vcmask 523264  }
 0x4f1   :  { %v1485_v43 = vsel %vm332_vm12, %v1483_v37, %v1438_v59 }
 0x4f8   :  { %v1456_v48 = vpop.permute.xlu0 %1455 }
 0x4f9   :  { %v1454_v25 = vpop.permute.xlu1 %1453 }
 0x4fc   :  { %v1448_v29 = vpop.permute.xlu0 %1447 }
 0x4fd   :  { %v1446_v36 = vpop.permute.xlu1 %1445  ;;  %v1489_v44 = vsel %vm1487_vm7, %v1486_v28, %v1448_v29 }
 0x4fe   :  { %v1488_v0 = vsel %vm1487_vm7, %v1485_v43, %v1446_v36  ;;  %v1492_v50 = vsel %vm1490_vm10, %v1489_v44, %v1456_v48 }
 0x4ff   :  { %v1491_v51 = vsel %vm1490_vm10, %v1488_v0, %v1454_v25 }
 0x53a   :  { %v1472_v7 = vpop.permute.xlu0 %1471 }
 0x53b   :  { %v1470_v24 = vpop.permute.xlu1 %1469 }
 0x53e   :  { %v1464_v41 = vpop.permute.xlu0 %1463 }
 0x53f   :  { %v1462_v45 = vpop.permute.xlu1 %1461  ;;  %v1495_v13 = vsel %vm1493_vm11, %v1492_v50, %v1464_v41 }
 0x540   :  { %v1494_v63 = vsel %vm1493_vm11, %v1491_v51, %v1462_v45  ;;  %v1498_v47 = vsel %vm1496_vm13, %v1495_v13, %v1472_v7 }
 0x541   :  { %v1497_v56 = vsel %vm1496_vm13, %v1494_v63, %v1470_v24 }
 0x542   :  { %v1480_v34 = vpop.permute.xlu0 %1479 }
 0x543   :  { %v1478_v60 = vpop.permute.xlu1 %1477  ;;  %v1501_v1 = vsel %vm1499_vm14, %v1498_v47, %v1480_v34 }
 0x544   :  { %v1500_v39 = vsel %vm1499_vm14, %v1497_v56, %v1478_v60 }
 0x545   :  { %1946 = vmatprep.mubr.msk.f32.mxu0 %vm1510_vm0, %v1500_v39 }
 0x546   :  { %1947 = vmatmul.mubr.msk.f32.vlgmr.msra.gmra.mrb[6].mxu0 %vm1510_vm0, %v1501_v1 }
 0x619   :  { %v1948_v58 = vpop.f32.mrb[6].mxu0 }
 0x61a   :  { %v1583_v53 = vpop.f32.mrb[7].mxu0  ;;  %v1600_v52 = vmul.f32 %v1948_v58, %v1820_v42  ;;  %v1609_v46 = vmul.f32 %v1948_v58, %v1821_v6 }
 0x61b   :  { %v1599_v20 = vmul.f32 %v1820_v42, %v1583_v53  ;;  %v2004_v61 = vpack.c.bf16 %v1948_v58, %v1583_v53  ;;  %v1608_v8 = vmul.f32 %v1821_v6, %v1583_v53 }
 0x61c   :  { %v1613_v9 = vsel %vm268_vm2, %v1600_v52, 0.0  ;;  %v1619_v10 = vsel %vm268_vm2, %v1609_v46, 0.0 }
 0x61d   :  { %1614 = vadd.xlane.f32.xlu0 %v1613_v9  ;;  %2005 = vmatprep.subr.bf16.mxu1 %v2004_v61  ;;  %v1610_v4 = vsel %vm268_vm2, %v1599_v20, 0.0  ;;  %v1616_v23 = vsel %vm268_vm2, %v1608_v8, 0.0 }
 0x61e   :  { %2007 = vmatpush3.bf16.msra.mxu1 %v2004_v61  ;;  %1611 = vadd.xlane.f32.xlu1 %v1610_v4 }
 0x621   :  { %1617 = vadd.xlane.f32.xlu0 %v1616_v23 }
 0x622   :  { %1620 = vadd.xlane.f32.xlu1 %v1619_v10 }
 0x6aa   :  { %v1615_v11 = vpop.xlane.xlu0 %1614 }
 0x6ab   :  { %v1612_v22 = vpop.xlane.xlu1 %1611 }
 0x6ac   :  { %1622 = vxpose.xlu0.b32.start [1/2] (short) (narrow) %v1612_v22, 8 }
 0x6ae   :  { %v1618_v17 = vpop.xlane.xlu0 %1617 }
 0x6af   :  { %v1621_v16 = vpop.xlane.xlu1 %1620 }
 0x6b0   :  { %1623 = vxpose.xlu0.b32.end [2/2] (short) (narrow) %v1615_v11, 8 }
 0x72c   :  { %v1638_v14 = vpop.trf.xlu0 }
 0x72d   :  { %v1657_v15 = vrot.slane %v1638_v14, %v320_v62 }
 0x72f   :  { %v1658_v32 = vadd.f32 %v1657_v15, %v1618_v17  ;;  %v1659_v12 = vadd.f32 %v1657_v15, %v1621_v16 }
 0x731   :  { %v1662_v55 = vmul.f32 0.2, %v1658_v32  ;;  %v1663_v27 = vmul.f32 0.2, %v1659_v12  ;;  %vm1660_vm15 = vcmp.ge.f32.partialorder %v1658_v32, 0.0  ;;  %vm1661_vm1 = vcmp.ge.f32.partialorder %v1659_v12, 0.0 }
 0x733   :  { %v1664_v31 = vsel %vm1660_vm15, %v1658_v32, %v1662_v55  ;;  %v1665_v30 = vsel %vm1661_vm1, %v1659_v12, %v1663_v27 }
 0x734   :  { %v1666_v59 = vsel %vm35_vm8, %v1664_v31, -1e+30  ;;  %v1667_v19 = vsel %vm36_vm9, %v1665_v30, -1e+30 }
 0x735   :  { %v1668_v40 = vsel %vm332_vm12, %v1666_v59, -inf  ;;  %v1671_v57 = vsel %vm332_vm12, %v1667_v19, -inf }
 0x736   :  { %1669 = vmax.xlane.f32.xlu1 %v1668_v40 }
 0x73a   :  { %1672 = vmax.xlane.f32.xlu1 %v1671_v57 }
 0x7c3   :  { %v1670_v62 = vpop.xlane.xlu1 %1669 }
 0x7c4   :  { %v1674_v21 = vsub.f32 %v1666_v59, %v1670_v62 }
 0x7c6   :  { %v1676_v48 = vmul.f32 1.442695, %v1674_v21 }
 0x7c7   :  { %v1673_v35 = vpop.xlane.xlu1 %1672 }
 0x7c8   :  { %2156 = vpow2.f32 %v1676_v48  ;;  %v1675_v25 = vsub.f32 %v1667_v19, %v1673_v35 }
 0x7ca   :  { %v1678_v26 = vmul.f32 1.442695, %v1675_v25 }
 0x7cc   :  { %2158 = vpow2.f32 %v1678_v26 }
 0x7d2   :  { %v2157_v33 = vpop.eup %2156 }
 0x7d3   :  { %v1680_v2 = vmul.f32 %v2157_v33, %v2506_v49 }
 0x7d5   :  { %v1682_v29 = vsel %vm332_vm12, %v1680_v2, 0.0 }
 0x7d6   :  { %v2159_v54 = vpop.eup %2158  ;;  %1683 = vadd.xlane.f32.xlu1 %v1682_v29 }
 0x7d7   :  { %v1681_v3 = vmul.f32 %v2159_v54, %v2514_v18 }
 0x7d9   :  { %v1685_v36 = vsel %vm332_vm12, %v1681_v3, 0.0 }
 0x7da   :  { %1686 = vadd.xlane.f32.xlu1 %v1685_v36 }
 0x863   :  { %v1684_v5 = vpop.xlane.xlu1 %1683 }
 0x864   :  { %v1688_v37 = vmax.f32 %v1684_v5, 1e-30 }
 0x866   :  { %2160 = vrcp.f32 %v1688_v37 }
 0x867   :  { %v1687_v38 = vpop.xlane.xlu1 %1686 }
 0x868   :  { %v1689_v7 = vmax.f32 %v1687_v38, 1e-30 }
 0x86a   :  { %2162 = vrcp.f32 %v1689_v7 }
 0x870   :  { %v2161_v43 = vpop.eup %2160 }
 0x871   :  { %v1691_v24 = vmul.f32 %v2161_v43, %v1680_v2 }
 0x873   :  { %1953 = vmatprep.mubr.msk.f32.mxu1 %vm332_vm12, %v1691_v24 }
 0x874   :  { %v2163_v49 = vpop.eup %2162 }
 0x875   :  { %v1693_v28 = vmul.f32 %v2163_v49, %v1681_v3 }
 0x877   :  { %1954 = vmatmul.mubr.msk.f32.vlgmr.msra.gmra.mrb[10].mxu1 %vm332_vm12, %v1693_v28 }
 0x94a   :  { %v1955_v0 = vpop.f32.mrb[10].mxu1 }
 0x94b   :  { %1776 = vst.msk [vmem:[%s2747_s8 + $0x8] sm:$0xff] %vm268_vm2, %v1955_v0  ;;  %v1766_v18 = vpop.f32.mrb[11].mxu1 }
 0x94c   :  { %1775 = vst.msk [vmem:[%s2747_s8] sm:$0xff] %vm268_vm2, %v1766_v18 }

</bundles_post_ra>
